<compile_context>
chip_gen: v7x
topology: tpu7x:2x2x1
jax: 0.10.0
libtpu: 0.0.40
codegen_flags: <defaults>
</compile_context>

<pallas_src>
import math
import functools

import jax
import jax.numpy as jnp
from jax import lax
from jax.experimental import pallas as pl
from jax.experimental.pallas import tpu as pltpu

# ---------------- configuration (small, consistent with the module) ----------------
VOCAB      = 50
PAD_IDX    = 0
VOCAB_PAD  = 64            # vocab table padded for aligned one-hot matmul
HIDDEN     = 32
NUM_HEADS  = 4
NUM_LAYERS = 2
FF         = 4 * HIDDEN    # feed_forward_size defaults to 4*hidden
MAX_SEQ    = 16
NUM_TOKEN_TYPES = 2
TT_PAD     = 8             # token-type table padded for aligned one-hot matmul
LN_EPS     = 1e-12
NEG_INF    = -1e9
B, T       = 2, 8


# ---------------- in-kernel helpers ----------------
def _layer_norm(x, g, b, eps=LN_EPS):
    # matches torch.nn.LayerNorm over the last dim (biased variance)
    mu  = jnp.mean(x, axis=-1, keepdims=True)
    var = jnp.mean(jnp.square(x - mu), axis=-1, keepdims=True)
    return (x - mu) * lax.rsqrt(var + eps) * g + b


def _gelu(x):
    # exact (erf) GELU to match torch.nn.GELU() default
    return 0.5 * x * (1.0 + lax.erf(x / math.sqrt(2.0)))


# ---------------- the single fused Pallas kernel ----------------
def fused_encoder_kernel(tok_ref, tt_ref, bias_ref,
                         wemb_ref, pemb_ref, temb_ref, embln_ref,
                         wqkv_ref, bqkv_ref, wo_ref, w1_ref, c1_ref, w2_ref, vec_ref,
                         o_ref, *, num_heads):
    Bk, Tk, _ = tok_ref.shape
    H   = wemb_ref.shape[1]
    dh  = H // num_heads
    nl  = wqkv_ref.shape[0]
    scale = 1.0 / math.sqrt(dh)
    f32, bf16 = jnp.float32, jnp.bfloat16

    # ---- embeddings: one-hot MXU "gather" from VMEM-resident tables ----
    tok = tok_ref[...]                                  # (B, T, 1) int32
    tt  = tt_ref[...]                                   # (B, T, 1) int32
    oh_w = (lax.broadcasted_iota(jnp.int32, (Bk, Tk, wemb_ref.shape[0]), 2) == tok).astype(f32)
    oh_t = (lax.broadcasted_iota(jnp.int32, (Bk, Tk, temb_ref.shape[0]), 2) == tt).astype(f32)
    word = jnp.dot(oh_w.reshape(Bk * Tk, -1), wemb_ref[...], preferred_element_type=f32)
    ttyp = jnp.dot(oh_t.reshape(Bk * Tk, -1), temb_ref[...], preferred_element_type=f32)
    pos  = pemb_ref[0:Tk, :]                            # learned positional rows 0..T-1
    x = word.reshape(Bk, Tk, H) + ttyp.reshape(Bk, Tk, H) + pos[None, :, :]

    # embeddings layer norm
    x = _layer_norm(x, embln_ref[0:1, :], embln_ref[1:2, :])

    # additive key-padding bias, replicated over heads along the leading batch axis
    bias   = bias_ref[...]                              # (B, 1, T); 0 valid, -1e9 pad
    bias_x = jnp.concatenate([bias] * num_heads, axis=0)  # (nh*B, 1, T)

    def linear(inp, w, b):
        # bf16 MXU operands, f32 accumulation; element-wise math stays f32
        return jnp.einsum('bti,io->bto', inp.astype(bf16), w,
                          preferred_element_type=f32) + b

    # ---- encoder stack (static unroll; NUM_LAYERS is tiny) ----
    for l in range(nl):
        wqkv, bqkv = wqkv_ref[l], bqkv_ref[l]
        wo, w1, c1, w2 = wo_ref[l], w1_ref[l], c1_ref[l], w2_ref[l]
        vec = vec_ref[l]                                # (8, H) packed small operands
        bo, g1, b1 = vec[0:1, :], vec[1:2, :], vec[2:3, :]
        c2, g2, b2 = vec[3:4, :], vec[4:5, :], vec[5:6, :]

        # fused Q/K/V projection
        qkv = linear(x, wqkv, bqkv)                     # (B, T, 3H) f32
        q, k, v = qkv[:, :, :H], qkv[:, :, H:2 * H], qkv[:, :, 2 * H:]

        # fold heads into the leading batch axis -> (nh*B, T, dh)
        qh = jnp.concatenate([q[:, :, h * dh:(h + 1) * dh] for h in range(num_heads)], 0)
        kh = jnp.concatenate([k[:, :, h * dh:(h + 1) * dh] for h in range(num_heads)], 0)
        vh = jnp.concatenate([v[:, :, h * dh:(h + 1) * dh] for h in range(num_heads)], 0)

        s = jnp.einsum('xqd,xkd->xqk', qh.astype(bf16), kh.astype(bf16),
                       preferred_element_type=f32) * scale
        s = s + bias_x                                  # masked_fill(~mask, -1e9) equivalent

        # explicit softmax (f32); reciprocal runs on the EUP slot
        m = jnp.max(s, axis=-1, keepdims=True)
        e = jnp.exp(s - m)
        p = e * pl.reciprocal(jnp.sum(e, axis=-1, keepdims=True), approx=True)

        ctx = jnp.einsum('xqk,xkd->xqd', p.astype(bf16), vh.astype(bf16),
                         preferred_element_type=f32)    # (nh*B, T, dh)
        attn = jnp.concatenate([ctx[h * Bk:(h + 1) * Bk] for h in range(num_heads)], -1)

        attn = linear(attn, wo, bo)                     # output projection
        # residual + post layer norm (dropout = eval-mode identity)
        y = _layer_norm(x + attn, g1, b1)

        # feed-forward block
        h1 = _gelu(linear(y, w1, c1))                   # (B, T, FF)
        ff = linear(h1, w2, c2)                         # (B, T, H)
        x = _layer_norm(y + ff, g2, b2)

    o_ref[...] = x


# ---------------- wrapper: ONE pallas_call for the whole forward ----------------
def _vmem(n):
    return [pl.BlockSpec(memory_space=pltpu.MemorySpace.VMEM) for _ in range(n)]


@jax.jit
def transformer_encoder(params, tokens, token_type=None):
    Bt, Tt = tokens.shape
    if token_type is None:
        token_type = jnp.zeros_like(tokens)

    # create_pad_mask -> additive bias, computed once (0 where valid, -1e9 where pad)
    mask_bias = jnp.where(tokens != PAD_IDX, 0.0, NEG_INF).astype(jnp.float32)[:, None, :]

    args = (tokens.astype(jnp.int32)[:, :, None],       # (B, T, 1)
            token_type.astype(jnp.int32)[:, :, None],   # (B, T, 1)
            mask_bias,                                   # (B, 1, T)
            params['word_emb'], params['pos_emb'], params['tok_emb'], params['emb_ln'],
            params['wqkv'], params['bqkv'], params['wo'],
            params['w1'], params['c1'], params['w2'], params['vec'])

    return pl.pallas_call(
        functools.partial(fused_encoder_kernel, num_heads=NUM_HEADS),
        out_shape=jax.ShapeDtypeStruct((Bt, Tt, HIDDEN), jnp.float32),
        in_specs=_vmem(len(args)),
        out_specs=pl.BlockSpec(memory_space=pltpu.MemorySpace.VMEM),
    )(*args)


# ---------------- parameter init (deterministic, synthetic) ----------------
def init_params(key):
    def normal(k, shape):
        return 0.02 * jax.random.normal(k, shape, jnp.float32)

    keys = iter(jax.random.split(key, 3 + 6 * NUM_LAYERS))

    word = jnp.zeros((VOCAB_PAD, HIDDEN), jnp.float32)
    word = word.at[:VOCAB].set(normal(next(keys), (VOCAB, HIDDEN)))
    word = word.at[PAD_IDX].set(0.0)                    # padding_idx row is zeros

    tok_type = jnp.zeros((TT_PAD, HIDDEN), jnp.float32)
    tok_type = tok_type.at[:NUM_TOKEN_TYPES].set(normal(next(keys), (NUM_TOKEN_TYPES, HIDDEN)))

    pos = normal(next(keys), (MAX_SEQ, HIDDEN))

    emb_ln = jnp.concatenate([jnp.ones((1, HIDDEN), jnp.float32),
                              jnp.zeros((1, HIDDEN), jnp.float32)], axis=0)  # rows: gamma, beta

    wqkv, wo, w1, w2 = [], [], [], []
    for _ in range(NUM_LAYERS):
        wq = normal(next(keys), (HIDDEN, HIDDEN))
        wk = normal(next(keys), (HIDDEN, HIDDEN))
        wv = normal(next(keys), (HIDDEN, HIDDEN))
        wqkv.append(jnp.concatenate([wq, wk, wv], axis=1))   # (H, 3H)
        wo.append(normal(next(keys), (HIDDEN, HIDDEN)))
        w1.append(normal(next(keys), (HIDDEN, FF)))
        w2.append(normal(next(keys), (FF, HIDDEN)))

    # packed small operands: rows = [bo, g1, b1, c2, g2, b2, 0, 0]
    vec = jnp.zeros((NUM_LAYERS, 8, HIDDEN), jnp.float32)
    vec = vec.at[:, 1].set(1.0)   # g1 (post-attention LN gamma)
    vec = vec.at[:, 4].set(1.0)   # g2 (output LN gamma)

    return {
        'word_emb': word, 'pos_emb': pos, 'tok_emb': tok_type, 'emb_ln': emb_ln,
        'wqkv': jnp.stack(wqkv).astype(jnp.bfloat16),        # (L, H, 3H)
        'bqkv': jnp.zeros((NUM_LAYERS, 1, 3 * HIDDEN), jnp.float32),
        'wo':   jnp.stack(wo).astype(jnp.bfloat16),          # (L, H, H)
        'w1':   jnp.stack(w1).astype(jnp.bfloat16),          # (L, H, FF)
        'c1':   jnp.zeros((NUM_LAYERS, 1, FF), jnp.float32),
        'w2':   jnp.stack(w2).astype(jnp.bfloat16),          # (L, FF, H)
        'vec':  vec,                                         # (L, 8, H)
    }


if __name__ == "__main__":
    key = jax.random.PRNGKey(0)
    pkey, tkey = jax.random.split(key)

    params = init_params(pkey)
    tokens = jax.random.randint(tkey, (B, T), 1, VOCAB, dtype=jnp.int32)
    tokens = tokens.at[1, -2:].set(PAD_IDX)   # pad the tail of sequence 1 to exercise the mask

    out = transformer_encoder(params, tokens)
    out = jax.block_until_ready(out)

    assert out.shape == (B, T, HIDDEN) and out.dtype == jnp.float32
    assert bool(jnp.all(jnp.isfinite(out)))
    print("KERNEL_OK")
</pallas_src>

<mosaic_0001>
module attributes {stable_mosaic.version = 11 : i64} {
  func.func @fused_encoder_kernel(%arg0: memref<2x8x1xi32, #tpu.memory_space<vmem>>, %arg1: memref<2x8x1xi32, #tpu.memory_space<vmem>>, %arg2: memref<2x1x8xf32, #tpu.memory_space<vmem>>, %arg3: memref<64x32xf32, #tpu.memory_space<vmem>>, %arg4: memref<16x32xf32, #tpu.memory_space<vmem>>, %arg5: memref<8x32xf32, #tpu.memory_space<vmem>>, %arg6: memref<2x32xf32, #tpu.memory_space<vmem>>, %arg7: memref<2x32x96xbf16, #tpu.memory_space<vmem>>, %arg8: memref<2x1x96xf32, #tpu.memory_space<vmem>>, %arg9: memref<2x32x32xbf16, #tpu.memory_space<vmem>>, %arg10: memref<2x32x128xbf16, #tpu.memory_space<vmem>>, %arg11: memref<2x1x128xf32, #tpu.memory_space<vmem>>, %arg12: memref<2x128x32xbf16, #tpu.memory_space<vmem>>, %arg13: memref<2x8x32xf32, #tpu.memory_space<vmem>>, %arg14: memref<2x8x32xf32, #tpu.memory_space<vmem>>) attributes {dimension_semantics = [], scalar_prefetch = 0 : i64, scratch_operands = 0 : i64, tpu.core_type = #tpu.core_type<tc>} {
    %c0 = arith.constant 0 : index
    %c0_0 = arith.constant 0 : index
    %c0_1 = arith.constant 0 : index
    %0 = vector.load %arg0[%c0, %c0_0, %c0_1] : memref<2x8x1xi32, #tpu.memory_space<vmem>>, vector<2x8x1xi32>
    %c0_2 = arith.constant 0 : index
    %c0_3 = arith.constant 0 : index
    %c0_4 = arith.constant 0 : index
    %1 = vector.load %arg1[%c0_2, %c0_3, %c0_4] : memref<2x8x1xi32, #tpu.memory_space<vmem>>, vector<2x8x1xi32>
    %2 = tpu.iota {dimensions = array<i32: 2>} : vector<2x8x64xi32>
    %3 = vector.broadcast %0 : vector<2x8x1xi32> to vector<2x8x64xi32>
    %4 = arith.cmpi eq, %2, %3 : vector<2x8x64xi32>
    %5 = arith.extui %4 : vector<2x8x64xi1> to vector<2x8x64xi32>
    %6 = arith.sitofp %5 : vector<2x8x64xi32> to vector<2x8x64xf32>
    %7 = tpu.iota {dimensions = array<i32: 2>} : vector<2x8x8xi32>
    %8 = vector.broadcast %1 : vector<2x8x1xi32> to vector<2x8x8xi32>
    %9 = arith.cmpi eq, %7, %8 : vector<2x8x8xi32>
    %10 = arith.extui %9 : vector<2x8x8xi1> to vector<2x8x8xi32>
    %11 = arith.sitofp %10 : vector<2x8x8xi32> to vector<2x8x8xf32>
    %12 = vector.shape_cast %6 : vector<2x8x64xf32> to vector<16x64xf32>
    %c0_5 = arith.constant 0 : index
    %c0_6 = arith.constant 0 : index
    %13 = vector.load %arg3[%c0_5, %c0_6] : memref<64x32xf32, #tpu.memory_space<vmem>>, vector<64x32xf32>
    %cst = arith.constant dense<0.000000e+00> : vector<16x32xf32>
    %14 = tpu.matmul %12, %13, %cst {dimension_numbers = #tpu.dot_dimension_numbers<[1], [0], [0], [1], [0, 0, 1, 1], [], []>} : vector<16x64xf32>, vector<64x32xf32>, vector<16x32xf32> -> vector<16x32xf32>
    %15 = vector.shape_cast %11 : vector<2x8x8xf32> to vector<16x8xf32>
    %c0_7 = arith.constant 0 : index
    %c0_8 = arith.constant 0 : index
    %16 = vector.load %arg5[%c0_7, %c0_8] : memref<8x32xf32, #tpu.memory_space<vmem>>, vector<8x32xf32>
    %cst_9 = arith.constant dense<0.000000e+00> : vector<16x32xf32>
    %17 = tpu.matmul %15, %16, %cst_9 {dimension_numbers = #tpu.dot_dimension_numbers<[1], [0], [0], [1], [0, 0, 1, 1], [], []>} : vector<16x8xf32>, vector<8x32xf32>, vector<16x32xf32> -> vector<16x32xf32>
    %c0_10 = arith.constant 0 : index
    %c0_11 = arith.constant 0 : index
    %18 = vector.load %arg4[%c0_10, %c0_11] : memref<16x32xf32, #tpu.memory_space<vmem>>, vector<8x32xf32>
    %19 = vector.shape_cast %14 : vector<16x32xf32> to vector<2x8x32xf32>
    %20 = vector.shape_cast %17 : vector<16x32xf32> to vector<2x8x32xf32>
    %21 = arith.addf %19, %20 : vector<2x8x32xf32>
    %22 = vector.shape_cast %18 : vector<8x32xf32> to vector<1x8x32xf32>
    %23 = vector.broadcast %22 : vector<1x8x32xf32> to vector<2x8x32xf32>
    %24 = arith.addf %21, %23 : vector<2x8x32xf32>
    %c0_12 = arith.constant 0 : index
    %c0_13 = arith.constant 0 : index
    %25 = vector.load %arg6[%c0_12, %c0_13] : memref<2x32xf32, #tpu.memory_space<vmem>>, vector<1x32xf32>
    %c1 = arith.constant 1 : index
    %c0_14 = arith.constant 0 : index
    %26 = vector.load %arg6[%c1, %c0_14] : memref<2x32xf32, #tpu.memory_space<vmem>>, vector<1x32xf32>
    %cst_15 = arith.constant dense<0.000000e+00> : vector<2x8xf32>
    %27 = vector.multi_reduction <add>, %24, %cst_15 [2] : vector<2x8x32xf32> to vector<2x8xf32>
    %28 = vector.shape_cast %27 : vector<2x8xf32> to vector<2x8x1xf32>
    %cst_16 = arith.constant 3.200000e+01 : f32
    %29 = vector.broadcast %cst_16 : f32 to vector<2x8x1xf32>
    %30 = arith.divf %28, %29 : vector<2x8x1xf32>
    %31 = vector.broadcast %30 : vector<2x8x1xf32> to vector<2x8x32xf32>
    %32 = arith.subf %24, %31 : vector<2x8x32xf32>
    %33 = arith.mulf %32, %32 : vector<2x8x32xf32>
    %cst_17 = arith.constant dense<0.000000e+00> : vector<2x8xf32>
    %34 = vector.multi_reduction <add>, %33, %cst_17 [2] : vector<2x8x32xf32> to vector<2x8xf32>
    %35 = vector.shape_cast %34 : vector<2x8xf32> to vector<2x8x1xf32>
    %cst_18 = arith.constant 3.200000e+01 : f32
    %36 = vector.broadcast %cst_18 : f32 to vector<2x8x1xf32>
    %37 = arith.divf %35, %36 : vector<2x8x1xf32>
    %38 = vector.broadcast %30 : vector<2x8x1xf32> to vector<2x8x32xf32>
    %39 = arith.subf %24, %38 : vector<2x8x32xf32>
    %cst_19 = arith.constant 9.99999996E-13 : f32
    %40 = vector.broadcast %cst_19 : f32 to vector<2x8x1xf32>
    %41 = arith.addf %37, %40 : vector<2x8x1xf32>
    %42 = math.rsqrt %41 : vector<2x8x1xf32>
    %43 = vector.broadcast %42 : vector<2x8x1xf32> to vector<2x8x32xf32>
    %44 = arith.mulf %39, %43 : vector<2x8x32xf32>
    %45 = vector.shape_cast %25 : vector<1x32xf32> to vector<1x1x32xf32>
    %46 = vector.broadcast %45 : vector<1x1x32xf32> to vector<2x8x32xf32>
    %47 = arith.mulf %44, %46 : vector<2x8x32xf32>
    %48 = vector.shape_cast %26 : vector<1x32xf32> to vector<1x1x32xf32>
    %49 = vector.broadcast %48 : vector<1x1x32xf32> to vector<2x8x32xf32>
    %50 = arith.addf %47, %49 : vector<2x8x32xf32>
    %c0_20 = arith.constant 0 : index
    %c0_21 = arith.constant 0 : index
    %c0_22 = arith.constant 0 : index
    %51 = vector.load %arg2[%c0_20, %c0_21, %c0_22] : memref<2x1x8xf32, #tpu.memory_space<vmem>>, vector<2x1x8xf32>
    %52 = tpu.concatenate %51, %51, %51, %51 in 0 : vector<2x1x8xf32>, vector<2x1x8xf32>, vector<2x1x8xf32>, vector<2x1x8xf32> -> vector<8x1x8xf32>
    %c0_23 = arith.constant 0 : index
    %c0_24 = arith.constant 0 : index
    %c0_25 = arith.constant 0 : index
    %53 = vector.load %arg7[%c0_23, %c0_24, %c0_25] : memref<2x32x96xbf16, #tpu.memory_space<vmem>>, vector<1x32x96xbf16>
    %54 = vector.shape_cast %53 : vector<1x32x96xbf16> to vector<32x96xbf16>
    %c0_26 = arith.constant 0 : index
    %c0_27 = arith.constant 0 : index
    %c0_28 = arith.constant 0 : index
    %55 = vector.load %arg8[%c0_26, %c0_27, %c0_28] : memref<2x1x96xf32, #tpu.memory_space<vmem>>, vector<1x1x96xf32>
    %56 = vector.shape_cast %55 : vector<1x1x96xf32> to vector<1x96xf32>
    %c0_29 = arith.constant 0 : index
    %c0_30 = arith.constant 0 : index
    %c0_31 = arith.constant 0 : index
    %57 = vector.load %arg9[%c0_29, %c0_30, %c0_31] : memref<2x32x32xbf16, #tpu.memory_space<vmem>>, vector<1x32x32xbf16>
    %58 = vector.shape_cast %57 : vector<1x32x32xbf16> to vector<32x32xbf16>
    %c0_32 = arith.constant 0 : index
    %c0_33 = arith.constant 0 : index
    %c0_34 = arith.constant 0 : index
    %59 = vector.load %arg10[%c0_32, %c0_33, %c0_34] : memref<2x32x128xbf16, #tpu.memory_space<vmem>>, vector<1x32x128xbf16>
    %60 = vector.shape_cast %59 : vector<1x32x128xbf16> to vector<32x128xbf16>
    %c0_35 = arith.constant 0 : index
    %c0_36 = arith.constant 0 : index
    %c0_37 = arith.constant 0 : index
    %61 = vector.load %arg11[%c0_35, %c0_36, %c0_37] : memref<2x1x128xf32, #tpu.memory_space<vmem>>, vector<1x1x128xf32>
    %62 = vector.shape_cast %61 : vector<1x1x128xf32> to vector<1x128xf32>
    %c0_38 = arith.constant 0 : index
    %c0_39 = arith.constant 0 : index
    %c0_40 = arith.constant 0 : index
    %63 = vector.load %arg12[%c0_38, %c0_39, %c0_40] : memref<2x128x32xbf16, #tpu.memory_space<vmem>>, vector<1x128x32xbf16>
    %64 = vector.shape_cast %63 : vector<1x128x32xbf16> to vector<128x32xbf16>
    %c0_41 = arith.constant 0 : index
    %c0_42 = arith.constant 0 : index
    %c0_43 = arith.constant 0 : index
    %65 = vector.load %arg13[%c0_41, %c0_42, %c0_43] : memref<2x8x32xf32, #tpu.memory_space<vmem>>, vector<1x8x32xf32>
    %66 = vector.shape_cast %65 : vector<1x8x32xf32> to vector<8x32xf32>
    %67 = vector.extract_strided_slice %66 {offsets = [0, 0], sizes = [1, 32], strides = [1, 1]} : vector<8x32xf32> to vector<1x32xf32>
    %68 = vector.extract_strided_slice %66 {offsets = [1, 0], sizes = [1, 32], strides = [1, 1]} : vector<8x32xf32> to vector<1x32xf32>
    %69 = vector.extract_strided_slice %66 {offsets = [2, 0], sizes = [1, 32], strides = [1, 1]} : vector<8x32xf32> to vector<1x32xf32>
    %70 = vector.extract_strided_slice %66 {offsets = [3, 0], sizes = [1, 32], strides = [1, 1]} : vector<8x32xf32> to vector<1x32xf32>
    %71 = vector.extract_strided_slice %66 {offsets = [4, 0], sizes = [1, 32], strides = [1, 1]} : vector<8x32xf32> to vector<1x32xf32>
    %72 = vector.extract_strided_slice %66 {offsets = [5, 0], sizes = [1, 32], strides = [1, 1]} : vector<8x32xf32> to vector<1x32xf32>
    %73 = arith.truncf %50 : vector<2x8x32xf32> to vector<2x8x32xbf16>
    "tpu.trace_start"() <{level = 10 : i32, message = "bti,io->bto"}> : () -> ()
    %cst_44 = arith.constant dense<0.000000e+00> : vector<2x8x96xf32>
    %74 = tpu.matmul %73, %54, %cst_44 {dimension_numbers = #tpu.dot_dimension_numbers<[2], [0], [0, 1], [1], [0, 0, 0, 1, 1, 1], [], []>} : vector<2x8x32xbf16>, vector<32x96xbf16>, vector<2x8x96xf32> -> vector<2x8x96xf32>
    "tpu.trace_stop"() : () -> ()
    %75 = vector.shape_cast %56 : vector<1x96xf32> to vector<1x1x96xf32>
    %76 = vector.broadcast %75 : vector<1x1x96xf32> to vector<2x8x96xf32>
    %77 = arith.addf %74, %76 : vector<2x8x96xf32>
    %78 = vector.extract_strided_slice %77 {offsets = [0, 0, 0], sizes = [2, 8, 32], strides = [1, 1, 1]} : vector<2x8x96xf32> to vector<2x8x32xf32>
    %79 = vector.extract_strided_slice %77 {offsets = [0, 0, 32], sizes = [2, 8, 32], strides = [1, 1, 1]} : vector<2x8x96xf32> to vector<2x8x32xf32>
    %80 = vector.extract_strided_slice %77 {offsets = [0, 0, 64], sizes = [2, 8, 32], strides = [1, 1, 1]} : vector<2x8x96xf32> to vector<2x8x32xf32>
    %81 = vector.extract_strided_slice %78 {offsets = [0, 0, 0], sizes = [2, 8, 8], strides = [1, 1, 1]} : vector<2x8x32xf32> to vector<2x8x8xf32>
    %82 = vector.extract_strided_slice %78 {offsets = [0, 0, 8], sizes = [2, 8, 8], strides = [1, 1, 1]} : vector<2x8x32xf32> to vector<2x8x8xf32>
    %83 = vector.extract_strided_slice %78 {offsets = [0, 0, 16], sizes = [2, 8, 8], strides = [1, 1, 1]} : vector<2x8x32xf32> to vector<2x8x8xf32>
    %84 = vector.extract_strided_slice %78 {offsets = [0, 0, 24], sizes = [2, 8, 8], strides = [1, 1, 1]} : vector<2x8x32xf32> to vector<2x8x8xf32>
    %85 = tpu.concatenate %81, %82, %83, %84 in 0 : vector<2x8x8xf32>, vector<2x8x8xf32>, vector<2x8x8xf32>, vector<2x8x8xf32> -> vector<8x8x8xf32>
    %86 = vector.extract_strided_slice %79 {offsets = [0, 0, 0], sizes = [2, 8, 8], strides = [1, 1, 1]} : vector<2x8x32xf32> to vector<2x8x8xf32>
    %87 = vector.extract_strided_slice %79 {offsets = [0, 0, 8], sizes = [2, 8, 8], strides = [1, 1, 1]} : vector<2x8x32xf32> to vector<2x8x8xf32>
    %88 = vector.extract_strided_slice %79 {offsets = [0, 0, 16], sizes = [2, 8, 8], strides = [1, 1, 1]} : vector<2x8x32xf32> to vector<2x8x8xf32>
    %89 = vector.extract_strided_slice %79 {offsets = [0, 0, 24], sizes = [2, 8, 8], strides = [1, 1, 1]} : vector<2x8x32xf32> to vector<2x8x8xf32>
    %90 = tpu.concatenate %86, %87, %88, %89 in 0 : vector<2x8x8xf32>, vector<2x8x8xf32>, vector<2x8x8xf32>, vector<2x8x8xf32> -> vector<8x8x8xf32>
    %91 = vector.extract_strided_slice %80 {offsets = [0, 0, 0], sizes = [2, 8, 8], strides = [1, 1, 1]} : vector<2x8x32xf32> to vector<2x8x8xf32>
    %92 = vector.extract_strided_slice %80 {offsets = [0, 0, 8], sizes = [2, 8, 8], strides = [1, 1, 1]} : vector<2x8x32xf32> to vector<2x8x8xf32>
    %93 = vector.extract_strided_slice %80 {offsets = [0, 0, 16], sizes = [2, 8, 8], strides = [1, 1, 1]} : vector<2x8x32xf32> to vector<2x8x8xf32>
    %94 = vector.extract_strided_slice %80 {offsets = [0, 0, 24], sizes = [2, 8, 8], strides = [1, 1, 1]} : vector<2x8x32xf32> to vector<2x8x8xf32>
    %95 = tpu.concatenate %91, %92, %93, %94 in 0 : vector<2x8x8xf32>, vector<2x8x8xf32>, vector<2x8x8xf32>, vector<2x8x8xf32> -> vector<8x8x8xf32>
    %96 = arith.truncf %85 : vector<8x8x8xf32> to vector<8x8x8xbf16>
    %97 = arith.truncf %90 : vector<8x8x8xf32> to vector<8x8x8xbf16>
    "tpu.trace_start"() <{level = 10 : i32, message = "xqd,xkd->xqk"}> : () -> ()
    %cst_45 = arith.constant dense<0.000000e+00> : vector<8x8x8xf32>
    %98 = tpu.matmul %96, %97, %cst_45 {dimension_numbers = #tpu.dot_dimension_numbers<[2], [2], [1], [1], [0, 0, 0, 1, 1, 1], [0], [0]>} : vector<8x8x8xbf16>, vector<8x8x8xbf16>, vector<8x8x8xf32> -> vector<8x8x8xf32>
    "tpu.trace_stop"() : () -> ()
    %cst_46 = arith.constant 0.353553385 : f32
    %99 = vector.broadcast %cst_46 : f32 to vector<8x8x8xf32>
    %100 = arith.mulf %98, %99 : vector<8x8x8xf32>
    %101 = vector.broadcast %52 : vector<8x1x8xf32> to vector<8x8x8xf32>
    %102 = arith.addf %100, %101 : vector<8x8x8xf32>
    %cst_47 = arith.constant dense<0xFF800000> : vector<8x8xf32>
    %103 = vector.multi_reduction <maximumf>, %102, %cst_47 [2] : vector<8x8x8xf32> to vector<8x8xf32>
    %104 = vector.shape_cast %103 : vector<8x8xf32> to vector<8x8x1xf32>
    %105 = vector.broadcast %104 : vector<8x8x1xf32> to vector<8x8x8xf32>
    %106 = arith.subf %102, %105 : vector<8x8x8xf32>
    %107 = math.exp %106 : vector<8x8x8xf32>
    %cst_48 = arith.constant dense<0.000000e+00> : vector<8x8xf32>
    %108 = vector.multi_reduction <add>, %107, %cst_48 [2] : vector<8x8x8xf32> to vector<8x8xf32>
    %109 = vector.shape_cast %108 : vector<8x8xf32> to vector<8x8x1xf32>
    %110 = tpu.reciprocal %109 {approx = true} : vector<8x8x1xf32> -> vector<8x8x1xf32>
    %111 = vector.broadcast %110 : vector<8x8x1xf32> to vector<8x8x8xf32>
    %112 = arith.mulf %107, %111 : vector<8x8x8xf32>
    %113 = arith.truncf %112 : vector<8x8x8xf32> to vector<8x8x8xbf16>
    %114 = arith.truncf %95 : vector<8x8x8xf32> to vector<8x8x8xbf16>
    "tpu.trace_start"() <{level = 10 : i32, message = "xqk,xkd->xqd"}> : () -> ()
    %cst_49 = arith.constant dense<0.000000e+00> : vector<8x8x8xf32>
    %115 = tpu.matmul %113, %114, %cst_49 {dimension_numbers = #tpu.dot_dimension_numbers<[2], [1], [1], [2], [0, 0, 0, 1, 1, 2], [0], [0]>} : vector<8x8x8xbf16>, vector<8x8x8xbf16>, vector<8x8x8xf32> -> vector<8x8x8xf32>
    "tpu.trace_stop"() : () -> ()
    %116 = vector.extract_strided_slice %115 {offsets = [0, 0, 0], sizes = [2, 8, 8], strides = [1, 1, 1]} : vector<8x8x8xf32> to vector<2x8x8xf32>
    %117 = vector.extract_strided_slice %115 {offsets = [2, 0, 0], sizes = [2, 8, 8], strides = [1, 1, 1]} : vector<8x8x8xf32> to vector<2x8x8xf32>
    %118 = vector.extract_strided_slice %115 {offsets = [4, 0, 0], sizes = [2, 8, 8], strides = [1, 1, 1]} : vector<8x8x8xf32> to vector<2x8x8xf32>
    %119 = vector.extract_strided_slice %115 {offsets = [6, 0, 0], sizes = [2, 8, 8], strides = [1, 1, 1]} : vector<8x8x8xf32> to vector<2x8x8xf32>
    %120 = tpu.concatenate %116, %117, %118, %119 in 2 : vector<2x8x8xf32>, vector<2x8x8xf32>, vector<2x8x8xf32>, vector<2x8x8xf32> -> vector<2x8x32xf32>
    %121 = arith.truncf %120 : vector<2x8x32xf32> to vector<2x8x32xbf16>
    "tpu.trace_start"() <{level = 10 : i32, message = "bti,io->bto"}> : () -> ()
    %cst_50 = arith.constant dense<0.000000e+00> : vector<2x8x32xf32>
    %122 = tpu.matmul %121, %58, %cst_50 {dimension_numbers = #tpu.dot_dimension_numbers<[2], [0], [0, 1], [1], [0, 0, 0, 1, 1, 1], [], []>} : vector<2x8x32xbf16>, vector<32x32xbf16>, vector<2x8x32xf32> -> vector<2x8x32xf32>
    "tpu.trace_stop"() : () -> ()
    %123 = vector.shape_cast %67 : vector<1x32xf32> to vector<1x1x32xf32>
    %124 = vector.broadcast %123 : vector<1x1x32xf32> to vector<2x8x32xf32>
    %125 = arith.addf %122, %124 : vector<2x8x32xf32>
    %126 = arith.addf %50, %125 : vector<2x8x32xf32>
    %cst_51 = arith.constant dense<0.000000e+00> : vector<2x8xf32>
    %127 = vector.multi_reduction <add>, %126, %cst_51 [2] : vector<2x8x32xf32> to vector<2x8xf32>
    %128 = vector.shape_cast %127 : vector<2x8xf32> to vector<2x8x1xf32>
    %cst_52 = arith.constant 3.200000e+01 : f32
    %129 = vector.broadcast %cst_52 : f32 to vector<2x8x1xf32>
    %130 = arith.divf %128, %129 : vector<2x8x1xf32>
    %131 = vector.broadcast %130 : vector<2x8x1xf32> to vector<2x8x32xf32>
    %132 = arith.subf %126, %131 : vector<2x8x32xf32>
    %133 = arith.mulf %132, %132 : vector<2x8x32xf32>
    %cst_53 = arith.constant dense<0.000000e+00> : vector<2x8xf32>
    %134 = vector.multi_reduction <add>, %133, %cst_53 [2] : vector<2x8x32xf32> to vector<2x8xf32>
    %135 = vector.shape_cast %134 : vector<2x8xf32> to vector<2x8x1xf32>
    %cst_54 = arith.constant 3.200000e+01 : f32
    %136 = vector.broadcast %cst_54 : f32 to vector<2x8x1xf32>
    %137 = arith.divf %135, %136 : vector<2x8x1xf32>
    %138 = vector.broadcast %130 : vector<2x8x1xf32> to vector<2x8x32xf32>
    %139 = arith.subf %126, %138 : vector<2x8x32xf32>
    %cst_55 = arith.constant 9.99999996E-13 : f32
    %140 = vector.broadcast %cst_55 : f32 to vector<2x8x1xf32>
    %141 = arith.addf %137, %140 : vector<2x8x1xf32>
    %142 = math.rsqrt %141 : vector<2x8x1xf32>
    %143 = vector.broadcast %142 : vector<2x8x1xf32> to vector<2x8x32xf32>
    %144 = arith.mulf %139, %143 : vector<2x8x32xf32>
    %145 = vector.shape_cast %68 : vector<1x32xf32> to vector<1x1x32xf32>
    %146 = vector.broadcast %145 : vector<1x1x32xf32> to vector<2x8x32xf32>
    %147 = arith.mulf %144, %146 : vector<2x8x32xf32>
    %148 = vector.shape_cast %69 : vector<1x32xf32> to vector<1x1x32xf32>
    %149 = vector.broadcast %148 : vector<1x1x32xf32> to vector<2x8x32xf32>
    %150 = arith.addf %147, %149 : vector<2x8x32xf32>
    %151 = arith.truncf %150 : vector<2x8x32xf32> to vector<2x8x32xbf16>
    "tpu.trace_start"() <{level = 10 : i32, message = "bti,io->bto"}> : () -> ()
    %cst_56 = arith.constant dense<0.000000e+00> : vector<2x8x128xf32>
    %152 = tpu.matmul %151, %60, %cst_56 {dimension_numbers = #tpu.dot_dimension_numbers<[2], [0], [0, 1], [1], [0, 0, 0, 1, 1, 1], [], []>} : vector<2x8x32xbf16>, vector<32x128xbf16>, vector<2x8x128xf32> -> vector<2x8x128xf32>
    "tpu.trace_stop"() : () -> ()
    %153 = vector.shape_cast %62 : vector<1x128xf32> to vector<1x1x128xf32>
    %154 = vector.broadcast %153 : vector<1x1x128xf32> to vector<2x8x128xf32>
    %155 = arith.addf %152, %154 : vector<2x8x128xf32>
    %cst_57 = arith.constant 5.000000e-01 : f32
    %156 = vector.broadcast %cst_57 : f32 to vector<2x8x128xf32>
    %157 = arith.mulf %156, %155 : vector<2x8x128xf32>
    %cst_58 = arith.constant 1.41421354 : f32
    %158 = vector.broadcast %cst_58 : f32 to vector<2x8x128xf32>
    %159 = arith.divf %155, %158 : vector<2x8x128xf32>
    %160 = math.erf %159 : vector<2x8x128xf32>
    %cst_59 = arith.constant 1.000000e+00 : f32
    %161 = vector.broadcast %cst_59 : f32 to vector<2x8x128xf32>
    %162 = arith.addf %161, %160 : vector<2x8x128xf32>
    %163 = arith.mulf %157, %162 : vector<2x8x128xf32>
    %164 = arith.truncf %163 : vector<2x8x128xf32> to vector<2x8x128xbf16>
    "tpu.trace_start"() <{level = 10 : i32, message = "bti,io->bto"}> : () -> ()
    %cst_60 = arith.constant dense<0.000000e+00> : vector<2x8x32xf32>
    %165 = tpu.matmul %164, %64, %cst_60 {dimension_numbers = #tpu.dot_dimension_numbers<[2], [0], [0, 1], [1], [0, 0, 0, 1, 1, 1], [], []>} : vector<2x8x128xbf16>, vector<128x32xbf16>, vector<2x8x32xf32> -> vector<2x8x32xf32>
    "tpu.trace_stop"() : () -> ()
    %166 = vector.shape_cast %70 : vector<1x32xf32> to vector<1x1x32xf32>
    %167 = vector.broadcast %166 : vector<1x1x32xf32> to vector<2x8x32xf32>
    %168 = arith.addf %165, %167 : vector<2x8x32xf32>
    %169 = arith.addf %150, %168 : vector<2x8x32xf32>
    %cst_61 = arith.constant dense<0.000000e+00> : vector<2x8xf32>
    %170 = vector.multi_reduction <add>, %169, %cst_61 [2] : vector<2x8x32xf32> to vector<2x8xf32>
    %171 = vector.shape_cast %170 : vector<2x8xf32> to vector<2x8x1xf32>
    %cst_62 = arith.constant 3.200000e+01 : f32
    %172 = vector.broadcast %cst_62 : f32 to vector<2x8x1xf32>
    %173 = arith.divf %171, %172 : vector<2x8x1xf32>
    %174 = vector.broadcast %173 : vector<2x8x1xf32> to vector<2x8x32xf32>
    %175 = arith.subf %169, %174 : vector<2x8x32xf32>
    %176 = arith.mulf %175, %175 : vector<2x8x32xf32>
    %cst_63 = arith.constant dense<0.000000e+00> : vector<2x8xf32>
    %177 = vector.multi_reduction <add>, %176, %cst_63 [2] : vector<2x8x32xf32> to vector<2x8xf32>
    %178 = vector.shape_cast %177 : vector<2x8xf32> to vector<2x8x1xf32>
    %cst_64 = arith.constant 3.200000e+01 : f32
    %179 = vector.broadcast %cst_64 : f32 to vector<2x8x1xf32>
    %180 = arith.divf %178, %179 : vector<2x8x1xf32>
    %181 = vector.broadcast %173 : vector<2x8x1xf32> to vector<2x8x32xf32>
    %182 = arith.subf %169, %181 : vector<2x8x32xf32>
    %cst_65 = arith.constant 9.99999996E-13 : f32
    %183 = vector.broadcast %cst_65 : f32 to vector<2x8x1xf32>
    %184 = arith.addf %180, %183 : vector<2x8x1xf32>
    %185 = math.rsqrt %184 : vector<2x8x1xf32>
    %186 = vector.broadcast %185 : vector<2x8x1xf32> to vector<2x8x32xf32>
    %187 = arith.mulf %182, %186 : vector<2x8x32xf32>
    %188 = vector.shape_cast %71 : vector<1x32xf32> to vector<1x1x32xf32>
    %189 = vector.broadcast %188 : vector<1x1x32xf32> to vector<2x8x32xf32>
    %190 = arith.mulf %187, %189 : vector<2x8x32xf32>
    %191 = vector.shape_cast %72 : vector<1x32xf32> to vector<1x1x32xf32>
    %192 = vector.broadcast %191 : vector<1x1x32xf32> to vector<2x8x32xf32>
    %193 = arith.addf %190, %192 : vector<2x8x32xf32>
    %c1_66 = arith.constant 1 : index
    %c0_67 = arith.constant 0 : index
    %c0_68 = arith.constant 0 : index
    %194 = vector.load %arg7[%c1_66, %c0_67, %c0_68] : memref<2x32x96xbf16, #tpu.memory_space<vmem>>, vector<1x32x96xbf16>
    %195 = vector.shape_cast %194 : vector<1x32x96xbf16> to vector<32x96xbf16>
    %c1_69 = arith.constant 1 : index
    %c0_70 = arith.constant 0 : index
    %c0_71 = arith.constant 0 : index
    %196 = vector.load %arg8[%c1_69, %c0_70, %c0_71] : memref<2x1x96xf32, #tpu.memory_space<vmem>>, vector<1x1x96xf32>
    %197 = vector.shape_cast %196 : vector<1x1x96xf32> to vector<1x96xf32>
    %c1_72 = arith.constant 1 : index
    %c0_73 = arith.constant 0 : index
    %c0_74 = arith.constant 0 : index
    %198 = vector.load %arg9[%c1_72, %c0_73, %c0_74] : memref<2x32x32xbf16, #tpu.memory_space<vmem>>, vector<1x32x32xbf16>
    %199 = vector.shape_cast %198 : vector<1x32x32xbf16> to vector<32x32xbf16>
    %c1_75 = arith.constant 1 : index
    %c0_76 = arith.constant 0 : index
    %c0_77 = arith.constant 0 : index
    %200 = vector.load %arg10[%c1_75, %c0_76, %c0_77] : memref<2x32x128xbf16, #tpu.memory_space<vmem>>, vector<1x32x128xbf16>
    %201 = vector.shape_cast %200 : vector<1x32x128xbf16> to vector<32x128xbf16>
    %c1_78 = arith.constant 1 : index
    %c0_79 = arith.constant 0 : index
    %c0_80 = arith.constant 0 : index
    %202 = vector.load %arg11[%c1_78, %c0_79, %c0_80] : memref<2x1x128xf32, #tpu.memory_space<vmem>>, vector<1x1x128xf32>
    %203 = vector.shape_cast %202 : vector<1x1x128xf32> to vector<1x128xf32>
    %c1_81 = arith.constant 1 : index
    %c0_82 = arith.constant 0 : index
    %c0_83 = arith.constant 0 : index
    %204 = vector.load %arg12[%c1_81, %c0_82, %c0_83] : memref<2x128x32xbf16, #tpu.memory_space<vmem>>, vector<1x128x32xbf16>
    %205 = vector.shape_cast %204 : vector<1x128x32xbf16> to vector<128x32xbf16>
    %c1_84 = arith.constant 1 : index
    %c0_85 = arith.constant 0 : index
    %c0_86 = arith.constant 0 : index
    %206 = vector.load %arg13[%c1_84, %c0_85, %c0_86] : memref<2x8x32xf32, #tpu.memory_space<vmem>>, vector<1x8x32xf32>
    %207 = vector.shape_cast %206 : vector<1x8x32xf32> to vector<8x32xf32>
    %208 = vector.extract_strided_slice %207 {offsets = [0, 0], sizes = [1, 32], strides = [1, 1]} : vector<8x32xf32> to vector<1x32xf32>
    %209 = vector.extract_strided_slice %207 {offsets = [1, 0], sizes = [1, 32], strides = [1, 1]} : vector<8x32xf32> to vector<1x32xf32>
    %210 = vector.extract_strided_slice %207 {offsets = [2, 0], sizes = [1, 32], strides = [1, 1]} : vector<8x32xf32> to vector<1x32xf32>
    %211 = vector.extract_strided_slice %207 {offsets = [3, 0], sizes = [1, 32], strides = [1, 1]} : vector<8x32xf32> to vector<1x32xf32>
    %212 = vector.extract_strided_slice %207 {offsets = [4, 0], sizes = [1, 32], strides = [1, 1]} : vector<8x32xf32> to vector<1x32xf32>
    %213 = vector.extract_strided_slice %207 {offsets = [5, 0], sizes = [1, 32], strides = [1, 1]} : vector<8x32xf32> to vector<1x32xf32>
    %214 = arith.truncf %193 : vector<2x8x32xf32> to vector<2x8x32xbf16>
    "tpu.trace_start"() <{level = 10 : i32, message = "bti,io->bto"}> : () -> ()
    %cst_87 = arith.constant dense<0.000000e+00> : vector<2x8x96xf32>
    %215 = tpu.matmul %214, %195, %cst_87 {dimension_numbers = #tpu.dot_dimension_numbers<[2], [0], [0, 1], [1], [0, 0, 0, 1, 1, 1], [], []>} : vector<2x8x32xbf16>, vector<32x96xbf16>, vector<2x8x96xf32> -> vector<2x8x96xf32>
    "tpu.trace_stop"() : () -> ()
    %216 = vector.shape_cast %197 : vector<1x96xf32> to vector<1x1x96xf32>
    %217 = vector.broadcast %216 : vector<1x1x96xf32> to vector<2x8x96xf32>
    %218 = arith.addf %215, %217 : vector<2x8x96xf32>
    %219 = vector.extract_strided_slice %218 {offsets = [0, 0, 0], sizes = [2, 8, 32], strides = [1, 1, 1]} : vector<2x8x96xf32> to vector<2x8x32xf32>
    %220 = vector.extract_strided_slice %218 {offsets = [0, 0, 32], sizes = [2, 8, 32], strides = [1, 1, 1]} : vector<2x8x96xf32> to vector<2x8x32xf32>
    %221 = vector.extract_strided_slice %218 {offsets = [0, 0, 64], sizes = [2, 8, 32], strides = [1, 1, 1]} : vector<2x8x96xf32> to vector<2x8x32xf32>
    %222 = vector.extract_strided_slice %219 {offsets = [0, 0, 0], sizes = [2, 8, 8], strides = [1, 1, 1]} : vector<2x8x32xf32> to vector<2x8x8xf32>
    %223 = vector.extract_strided_slice %219 {offsets = [0, 0, 8], sizes = [2, 8, 8], strides = [1, 1, 1]} : vector<2x8x32xf32> to vector<2x8x8xf32>
    %224 = vector.extract_strided_slice %219 {offsets = [0, 0, 16], sizes = [2, 8, 8], strides = [1, 1, 1]} : vector<2x8x32xf32> to vector<2x8x8xf32>
    %225 = vector.extract_strided_slice %219 {offsets = [0, 0, 24], sizes = [2, 8, 8], strides = [1, 1, 1]} : vector<2x8x32xf32> to vector<2x8x8xf32>
    %226 = tpu.concatenate %222, %223, %224, %225 in 0 : vector<2x8x8xf32>, vector<2x8x8xf32>, vector<2x8x8xf32>, vector<2x8x8xf32> -> vector<8x8x8xf32>
    %227 = vector.extract_strided_slice %220 {offsets = [0, 0, 0], sizes = [2, 8, 8], strides = [1, 1, 1]} : vector<2x8x32xf32> to vector<2x8x8xf32>
    %228 = vector.extract_strided_slice %220 {offsets = [0, 0, 8], sizes = [2, 8, 8], strides = [1, 1, 1]} : vector<2x8x32xf32> to vector<2x8x8xf32>
    %229 = vector.extract_strided_slice %220 {offsets = [0, 0, 16], sizes = [2, 8, 8], strides = [1, 1, 1]} : vector<2x8x32xf32> to vector<2x8x8xf32>
    %230 = vector.extract_strided_slice %220 {offsets = [0, 0, 24], sizes = [2, 8, 8], strides = [1, 1, 1]} : vector<2x8x32xf32> to vector<2x8x8xf32>
    %231 = tpu.concatenate %227, %228, %229, %230 in 0 : vector<2x8x8xf32>, vector<2x8x8xf32>, vector<2x8x8xf32>, vector<2x8x8xf32> -> vector<8x8x8xf32>
    %232 = vector.extract_strided_slice %221 {offsets = [0, 0, 0], sizes = [2, 8, 8], strides = [1, 1, 1]} : vector<2x8x32xf32> to vector<2x8x8xf32>
    %233 = vector.extract_strided_slice %221 {offsets = [0, 0, 8], sizes = [2, 8, 8], strides = [1, 1, 1]} : vector<2x8x32xf32> to vector<2x8x8xf32>
    %234 = vector.extract_strided_slice %221 {offsets = [0, 0, 16], sizes = [2, 8, 8], strides = [1, 1, 1]} : vector<2x8x32xf32> to vector<2x8x8xf32>
    %235 = vector.extract_strided_slice %221 {offsets = [0, 0, 24], sizes = [2, 8, 8], strides = [1, 1, 1]} : vector<2x8x32xf32> to vector<2x8x8xf32>
    %236 = tpu.concatenate %232, %233, %234, %235 in 0 : vector<2x8x8xf32>, vector<2x8x8xf32>, vector<2x8x8xf32>, vector<2x8x8xf32> -> vector<8x8x8xf32>
    %237 = arith.truncf %226 : vector<8x8x8xf32> to vector<8x8x8xbf16>
    %238 = arith.truncf %231 : vector<8x8x8xf32> to vector<8x8x8xbf16>
    "tpu.trace_start"() <{level = 10 : i32, message = "xqd,xkd->xqk"}> : () -> ()
    %cst_88 = arith.constant dense<0.000000e+00> : vector<8x8x8xf32>
    %239 = tpu.matmul %237, %238, %cst_88 {dimension_numbers = #tpu.dot_dimension_numbers<[2], [2], [1], [1], [0, 0, 0, 1, 1, 1], [0], [0]>} : vector<8x8x8xbf16>, vector<8x8x8xbf16>, vector<8x8x8xf32> -> vector<8x8x8xf32>
    "tpu.trace_stop"() : () -> ()
    %cst_89 = arith.constant 0.353553385 : f32
    %240 = vector.broadcast %cst_89 : f32 to vector<8x8x8xf32>
    %241 = arith.mulf %239, %240 : vector<8x8x8xf32>
    %242 = vector.broadcast %52 : vector<8x1x8xf32> to vector<8x8x8xf32>
    %243 = arith.addf %241, %242 : vector<8x8x8xf32>
    %cst_90 = arith.constant dense<0xFF800000> : vector<8x8xf32>
    %244 = vector.multi_reduction <maximumf>, %243, %cst_90 [2] : vector<8x8x8xf32> to vector<8x8xf32>
    %245 = vector.shape_cast %244 : vector<8x8xf32> to vector<8x8x1xf32>
    %246 = vector.broadcast %245 : vector<8x8x1xf32> to vector<8x8x8xf32>
    %247 = arith.subf %243, %246 : vector<8x8x8xf32>
    %248 = math.exp %247 : vector<8x8x8xf32>
    %cst_91 = arith.constant dense<0.000000e+00> : vector<8x8xf32>
    %249 = vector.multi_reduction <add>, %248, %cst_91 [2] : vector<8x8x8xf32> to vector<8x8xf32>
    %250 = vector.shape_cast %249 : vector<8x8xf32> to vector<8x8x1xf32>
    %251 = tpu.reciprocal %250 {approx = true} : vector<8x8x1xf32> -> vector<8x8x1xf32>
    %252 = vector.broadcast %251 : vector<8x8x1xf32> to vector<8x8x8xf32>
    %253 = arith.mulf %248, %252 : vector<8x8x8xf32>
    %254 = arith.truncf %253 : vector<8x8x8xf32> to vector<8x8x8xbf16>
    %255 = arith.truncf %236 : vector<8x8x8xf32> to vector<8x8x8xbf16>
    "tpu.trace_start"() <{level = 10 : i32, message = "xqk,xkd->xqd"}> : () -> ()
    %cst_92 = arith.constant dense<0.000000e+00> : vector<8x8x8xf32>
    %256 = tpu.matmul %254, %255, %cst_92 {dimension_numbers = #tpu.dot_dimension_numbers<[2], [1], [1], [2], [0, 0, 0, 1, 1, 2], [0], [0]>} : vector<8x8x8xbf16>, vector<8x8x8xbf16>, vector<8x8x8xf32> -> vector<8x8x8xf32>
    "tpu.trace_stop"() : () -> ()
    %257 = vector.extract_strided_slice %256 {offsets = [0, 0, 0], sizes = [2, 8, 8], strides = [1, 1, 1]} : vector<8x8x8xf32> to vector<2x8x8xf32>
    %258 = vector.extract_strided_slice %256 {offsets = [2, 0, 0], sizes = [2, 8, 8], strides = [1, 1, 1]} : vector<8x8x8xf32> to vector<2x8x8xf32>
    %259 = vector.extract_strided_slice %256 {offsets = [4, 0, 0], sizes = [2, 8, 8], strides = [1, 1, 1]} : vector<8x8x8xf32> to vector<2x8x8xf32>
    %260 = vector.extract_strided_slice %256 {offsets = [6, 0, 0], sizes = [2, 8, 8], strides = [1, 1, 1]} : vector<8x8x8xf32> to vector<2x8x8xf32>
    %261 = tpu.concatenate %257, %258, %259, %260 in 2 : vector<2x8x8xf32>, vector<2x8x8xf32>, vector<2x8x8xf32>, vector<2x8x8xf32> -> vector<2x8x32xf32>
    %262 = arith.truncf %261 : vector<2x8x32xf32> to vector<2x8x32xbf16>
    "tpu.trace_start"() <{level = 10 : i32, message = "bti,io->bto"}> : () -> ()
    %cst_93 = arith.constant dense<0.000000e+00> : vector<2x8x32xf32>
    %263 = tpu.matmul %262, %199, %cst_93 {dimension_numbers = #tpu.dot_dimension_numbers<[2], [0], [0, 1], [1], [0, 0, 0, 1, 1, 1], [], []>} : vector<2x8x32xbf16>, vector<32x32xbf16>, vector<2x8x32xf32> -> vector<2x8x32xf32>
    "tpu.trace_stop"() : () -> ()
    %264 = vector.shape_cast %208 : vector<1x32xf32> to vector<1x1x32xf32>
    %265 = vector.broadcast %264 : vector<1x1x32xf32> to vector<2x8x32xf32>
    %266 = arith.addf %263, %265 : vector<2x8x32xf32>
    %267 = arith.addf %193, %266 : vector<2x8x32xf32>
    %cst_94 = arith.constant dense<0.000000e+00> : vector<2x8xf32>
    %268 = vector.multi_reduction <add>, %267, %cst_94 [2] : vector<2x8x32xf32> to vector<2x8xf32>
    %269 = vector.shape_cast %268 : vector<2x8xf32> to vector<2x8x1xf32>
    %cst_95 = arith.constant 3.200000e+01 : f32
    %270 = vector.broadcast %cst_95 : f32 to vector<2x8x1xf32>
    %271 = arith.divf %269, %270 : vector<2x8x1xf32>
    %272 = vector.broadcast %271 : vector<2x8x1xf32> to vector<2x8x32xf32>
    %273 = arith.subf %267, %272 : vector<2x8x32xf32>
    %274 = arith.mulf %273, %273 : vector<2x8x32xf32>
    %cst_96 = arith.constant dense<0.000000e+00> : vector<2x8xf32>
    %275 = vector.multi_reduction <add>, %274, %cst_96 [2] : vector<2x8x32xf32> to vector<2x8xf32>
    %276 = vector.shape_cast %275 : vector<2x8xf32> to vector<2x8x1xf32>
    %cst_97 = arith.constant 3.200000e+01 : f32
    %277 = vector.broadcast %cst_97 : f32 to vector<2x8x1xf32>
    %278 = arith.divf %276, %277 : vector<2x8x1xf32>
    %279 = vector.broadcast %271 : vector<2x8x1xf32> to vector<2x8x32xf32>
    %280 = arith.subf %267, %279 : vector<2x8x32xf32>
    %cst_98 = arith.constant 9.99999996E-13 : f32
    %281 = vector.broadcast %cst_98 : f32 to vector<2x8x1xf32>
    %282 = arith.addf %278, %281 : vector<2x8x1xf32>
    %283 = math.rsqrt %282 : vector<2x8x1xf32>
    %284 = vector.broadcast %283 : vector<2x8x1xf32> to vector<2x8x32xf32>
    %285 = arith.mulf %280, %284 : vector<2x8x32xf32>
    %286 = vector.shape_cast %209 : vector<1x32xf32> to vector<1x1x32xf32>
    %287 = vector.broadcast %286 : vector<1x1x32xf32> to vector<2x8x32xf32>
    %288 = arith.mulf %285, %287 : vector<2x8x32xf32>
    %289 = vector.shape_cast %210 : vector<1x32xf32> to vector<1x1x32xf32>
    %290 = vector.broadcast %289 : vector<1x1x32xf32> to vector<2x8x32xf32>
    %291 = arith.addf %288, %290 : vector<2x8x32xf32>
    %292 = arith.truncf %291 : vector<2x8x32xf32> to vector<2x8x32xbf16>
    "tpu.trace_start"() <{level = 10 : i32, message = "bti,io->bto"}> : () -> ()
    %cst_99 = arith.constant dense<0.000000e+00> : vector<2x8x128xf32>
    %293 = tpu.matmul %292, %201, %cst_99 {dimension_numbers = #tpu.dot_dimension_numbers<[2], [0], [0, 1], [1], [0, 0, 0, 1, 1, 1], [], []>} : vector<2x8x32xbf16>, vector<32x128xbf16>, vector<2x8x128xf32> -> vector<2x8x128xf32>
    "tpu.trace_stop"() : () -> ()
    %294 = vector.shape_cast %203 : vector<1x128xf32> to vector<1x1x128xf32>
    %295 = vector.broadcast %294 : vector<1x1x128xf32> to vector<2x8x128xf32>
    %296 = arith.addf %293, %295 : vector<2x8x128xf32>
    %cst_100 = arith.constant 5.000000e-01 : f32
    %297 = vector.broadcast %cst_100 : f32 to vector<2x8x128xf32>
    %298 = arith.mulf %297, %296 : vector<2x8x128xf32>
    %cst_101 = arith.constant 1.41421354 : f32
    %299 = vector.broadcast %cst_101 : f32 to vector<2x8x128xf32>
    %300 = arith.divf %296, %299 : vector<2x8x128xf32>
    %301 = math.erf %300 : vector<2x8x128xf32>
    %cst_102 = arith.constant 1.000000e+00 : f32
    %302 = vector.broadcast %cst_102 : f32 to vector<2x8x128xf32>
    %303 = arith.addf %302, %301 : vector<2x8x128xf32>
    %304 = arith.mulf %298, %303 : vector<2x8x128xf32>
    %305 = arith.truncf %304 : vector<2x8x128xf32> to vector<2x8x128xbf16>
    "tpu.trace_start"() <{level = 10 : i32, message = "bti,io->bto"}> : () -> ()
    %cst_103 = arith.constant dense<0.000000e+00> : vector<2x8x32xf32>
    %306 = tpu.matmul %305, %205, %cst_103 {dimension_numbers = #tpu.dot_dimension_numbers<[2], [0], [0, 1], [1], [0, 0, 0, 1, 1, 1], [], []>} : vector<2x8x128xbf16>, vector<128x32xbf16>, vector<2x8x32xf32> -> vector<2x8x32xf32>
    "tpu.trace_stop"() : () -> ()
    %307 = vector.shape_cast %211 : vector<1x32xf32> to vector<1x1x32xf32>
    %308 = vector.broadcast %307 : vector<1x1x32xf32> to vector<2x8x32xf32>
    %309 = arith.addf %306, %308 : vector<2x8x32xf32>
    %310 = arith.addf %291, %309 : vector<2x8x32xf32>
    %cst_104 = arith.constant dense<0.000000e+00> : vector<2x8xf32>
    %311 = vector.multi_reduction <add>, %310, %cst_104 [2] : vector<2x8x32xf32> to vector<2x8xf32>
    %312 = vector.shape_cast %311 : vector<2x8xf32> to vector<2x8x1xf32>
    %cst_105 = arith.constant 3.200000e+01 : f32
    %313 = vector.broadcast %cst_105 : f32 to vector<2x8x1xf32>
    %314 = arith.divf %312, %313 : vector<2x8x1xf32>
    %315 = vector.broadcast %314 : vector<2x8x1xf32> to vector<2x8x32xf32>
    %316 = arith.subf %310, %315 : vector<2x8x32xf32>
    %317 = arith.mulf %316, %316 : vector<2x8x32xf32>
    %cst_106 = arith.constant dense<0.000000e+00> : vector<2x8xf32>
    %318 = vector.multi_reduction <add>, %317, %cst_106 [2] : vector<2x8x32xf32> to vector<2x8xf32>
    %319 = vector.shape_cast %318 : vector<2x8xf32> to vector<2x8x1xf32>
    %cst_107 = arith.constant 3.200000e+01 : f32
    %320 = vector.broadcast %cst_107 : f32 to vector<2x8x1xf32>
    %321 = arith.divf %319, %320 : vector<2x8x1xf32>
    %322 = vector.broadcast %314 : vector<2x8x1xf32> to vector<2x8x32xf32>
    %323 = arith.subf %310, %322 : vector<2x8x32xf32>
    %cst_108 = arith.constant 9.99999996E-13 : f32
    %324 = vector.broadcast %cst_108 : f32 to vector<2x8x1xf32>
    %325 = arith.addf %321, %324 : vector<2x8x1xf32>
    %326 = math.rsqrt %325 : vector<2x8x1xf32>
    %327 = vector.broadcast %326 : vector<2x8x1xf32> to vector<2x8x32xf32>
    %328 = arith.mulf %323, %327 : vector<2x8x32xf32>
    %329 = vector.shape_cast %212 : vector<1x32xf32> to vector<1x1x32xf32>
    %330 = vector.broadcast %329 : vector<1x1x32xf32> to vector<2x8x32xf32>
    %331 = arith.mulf %328, %330 : vector<2x8x32xf32>
    %332 = vector.shape_cast %213 : vector<1x32xf32> to vector<1x1x32xf32>
    %333 = vector.broadcast %332 : vector<1x1x32xf32> to vector<2x8x32xf32>
    %334 = arith.addf %331, %333 : vector<2x8x32xf32>
    %c0_109 = arith.constant 0 : index
    %c0_110 = arith.constant 0 : index
    %c0_111 = arith.constant 0 : index
    %335 = vector.load %arg14[%c0_109, %c0_110, %c0_111] : memref<2x8x32xf32, #tpu.memory_space<vmem>>, vector<2x8x32xf32>
    tpu.vector_store %arg14[%c0_109, %c0_110, %c0_111], %334 {strides = array<i32>} : memref<2x8x32xf32, #tpu.memory_space<vmem>>, vector<2x8x32xf32>,
    return
  }
}

</mosaic_0001>

<bundles_post_ra>
// kernel: transformer_encoder.1
= control target key start
LH: loop header
LB: loop body
LE: loop exit
PB: predicated region body
PF: predicated region fallthrough
CT: control target
= control target key end

     0   :  { %v3873_v2 = vmov 0   ;;  %v3874_v17 = vmov 0.0   ;;  %s4652_s0 = inlined_call_operand.vmem [shape: s32[2,8,1], index: 0, kind: input, shape index: {}]   ;;  %s4653_s1 = inlined_call_operand.vmem [shape: s32[2,8,1], index: 1, kind: input, shape index: {}]   ;;  %s4654_s2 = inlined_call_operand.vmem [shape: f32[2,1,8], index: 2, kind: input, shape index: {}]   ;;  %s4655_s3 = inlined_call_operand.vmem [shape: f32[64,32], index: 3, kind: input, shape index: {}]   ;;  %s4656_s4 = inlined_call_operand.vmem [shape: f32[16,32], index: 4, kind: input, shape index: {}]   ;;  %s4657_s5 = inlined_call_operand.vmem [shape: f32[8,32], index: 5, kind: input, shape index: {}]   ;;  %s4658_s6 = inlined_call_operand.vmem [shape: f32[2,32], index: 6, kind: input, shape index: {}]   ;;  %s4659_s7 = inlined_call_operand.vmem [shape: bf16[2,32,96], index: 7, kind: input, shape index: {}]   ;;  %s4660_s8 = inlined_call_operand.vmem [shape: f32[2,1,96], index: 8, kind: input, shape index: {}]   ;;  %s4661_s9 = inlined_call_operand.vmem [shape: bf16[2,32,32], index: 9, kind: input, shape index: {}]   ;;  %s4662_s10 = inlined_call_operand.vmem [shape: bf16[2,32,128], index: 10, kind: input, shape index: {}]   ;;  %s4663_s11 = inlined_call_operand.vmem [shape: f32[2,1,128], index: 11, kind: input, shape index: {}]   ;;  %s4664_s12 = inlined_call_operand.vmem [shape: bf16[2,128,32], index: 12, kind: input, shape index: {}]   ;;  %s4665_s13 = inlined_call_operand.vmem [shape: f32[2,8,32], index: 13, kind: input, shape index: {}]   ;;  %s4666_s14 = inlined_call_operand.hbm [shape: f32[2,8,32], index: 14, kind: output, shape index: {}]  }
   0x1   :  { %v50_v0 = vld [vmem:[%s4652_s0 + $0x8] sm:$0xff]  ;;  %v49_v1 = vld [vmem:[%s4652_s0] sm:$0xff]  ;;  %3666 = vset.pattern.permute.xlu1 %v3873_v2  ;;  %3665 = vset.pattern.permute.xlu0 %v3873_v2  ;;  %v81_v7 = vld [vmem:[%s4655_s3 + $0x10] sm:$0xff] }
   0x2   :  { %v79_v3 = vld [vmem:[%s4655_s3] sm:$0xff]  ;;  %v80_v4 = vld [vmem:[%s4655_s3 + $0x8] sm:$0xff]  ;;  %59 = vperm.xlu1 %3666, %v50_v0   ;;  %56 = vperm.xlu0 %3665, %v49_v1   ;;  %v82_v8 = vld [vmem:[%s4655_s3 + $0x18] sm:$0xff] }
   0x3   :  { %v52_v5 = vld [vmem:[%s4653_s1 + $0x8] sm:$0xff]  ;;  %v3634_v6 = vpack.c.bf16 %v80_v4, %v79_v3  ;;  %v51_v9 = vld [vmem:[%s4653_s1] sm:$0xff]  ;;  %v3638_v10 = vpack.c.bf16 %v82_v8, %v81_v7  ;;  %v85_v13 = vld [vmem:[%s4655_s3 + $0x30] sm:$0xff] }
   0x4   :  { %v83_v11 = vld [vmem:[%s4655_s3 + $0x20] sm:$0xff]  ;;  %v84_v12 = vld [vmem:[%s4655_s3 + $0x28] sm:$0xff]  ;;  %v86_v16 = vld [vmem:[%s4655_s3 + $0x38] sm:$0xff] }
   0x5   :  { %3635 = vmatprep.subr.bf16.mxu0 %v3634_v6  ;;  %v3642_v14 = vpack.c.bf16 %v84_v12, %v83_v11  ;;  %v169_v15 = vld [vmem:[%s4657_s5] sm:$0xff]  ;;  %v3646_v18 = vpack.c.bf16 %v86_v16, %v85_v13 }
   0x6   :  { %3637 = vmatpush3.bf16.msra.mxu0 %v3634_v6  ;;  %71 = vperm.xlu1 %3666, %v52_v5  }
   0x7   :  { %68 = vperm.xlu0 %3665, %v51_v9   ;;  %3639 = vmatprep.subr.bf16.mxu0 %v3638_v10 }
   0x8   :  { %3349 = vmatprep.subr.mxu1 %v169_v15 }
   0x9   :  { %3350 = vmatpush3.msra.mxu1 %v169_v15 }
   0xa   :  { %3641 = vmatpush3.bf16.msra.mxu0 %v3638_v10  ;;  %3368 = vmatprep.subr.bf16.mxu1 %v3874_v17 }
   0xb   :  { %3643 = vmatprep.subr.bf16.mxu0 %v3642_v14 }
   0xe   :  { %3645 = vmatpush3.bf16.msra.mxu0 %v3642_v14 }
   0xf   :  { %3647 = vmatprep.subr.bf16.mxu0 %v3646_v18 }
  0x12   :  { %3649 = vmatpush3.bf16.msra.mxu0 %v3646_v18 }
  0x13   :  { %3354 = vmatprep.subr.bf16.mxu0 %v3874_v17 }
  0x14   :  { %19 = vsyncpa [#allocation3], 0  ;;  %v53_v19 = vlaneseq  ;;  %vm87_vm0 = vcmask 523264   ;;  %vm170_vm3 = vcmask 64512   ;;  %v252_v32 = vld [vmem:[%s4656_s4] sm:$0xff]  ;;  %vm259_vm6 = vcmask 261120  }
  0x15   :  { %v3727_v50 = vld [vmem:[%s4659_s7] sm:$0xff]   ;;  %v3728_v51 = vld [vmem:[%s4659_s7 + $0x8] sm:$0xff]   ;;  %vm3875_vm7 = vmmov 0   ;;  %s3877_s29 = smov 120   ;;  %s3878_s30 = smov 104   ;;  %vm950_vm8 = vcmask 1043456  }
  0x16   :  { %v54_v20 = vand.u32 127, %v53_v19  ;;  %v3096_v60 = vld [vmem:[%s4658_s6] ss:$0 sm:$0xff]  ;;  %v3097_v0 = vld [vmem:[%s4658_s6 + $0x1] ss:$0 sm:$0xff]  ;;  %s3876_s6 = smov 112  }
  0x17   :  { %v3098_v5 = vld [vmem:[%s4660_s8] ss:$0 sm:$0xff]  ;;  %s3879_s15 = smov 96   ;;  %s3880_s16 = smov 64   ;;  %vm1356_vm9 = vcmask 130048   ;;  %vm1359_vm10 = vcmask 195584  }
  0x18   :  { %s3881_s20 = smov 8   ;;  %s3882_s22 = smov 16  }
  0x19   :  { %s3883_s23 = smov 24  }
  0x81   :  { %v60_v21 = vpop.permute.xlu1 %59  ;;  %v57_v22 = vpop.permute.xlu0 %56 }
  0x82   :  { %vm62_vm1 = vcmp.eq.s32.totalorder %v54_v20, %v60_v21  ;;  %vm61_vm2 = vcmp.eq.s32.totalorder %v54_v20, %v57_v22 }
  0x83   :  { %v3089_v23 = vsel %vm62_vm1, 1.0, %v3874_v17  ;;  %v3088_v24 = vsel %vm61_vm2, 1.0, %v3874_v17 }
  0x84   :  { %3346 = vmatprep.mubr.msk.f32.mxu0 %vm87_vm0, %v3088_v24 }
  0x85   :  { %v72_v25 = vpop.permute.xlu1 %71  ;;  %3347 = vmatmul.mubr.msk.f32.vlgmr.msra.gmra.mrb[0].mxu0 %vm87_vm0, %v3089_v23 }
  0x86   :  { %v69_v26 = vpop.permute.xlu0 %68  ;;  %vm74_vm4 = vcmp.eq.s32.totalorder %v54_v20, %v72_v25  ;;  %3355 = vmatpush3.bf16.msra.mxu0 %v3727_v50  ;;  %3358 = vmatprep.mubr.msk.bf16.mxu0 %vm3875_vm7, %v3874_v17 }
  0x87   :  { %vm73_vm5 = vcmp.eq.s32.totalorder %v54_v20, %v69_v26  ;;  %v3091_v27 = vsel %vm74_vm4, 1.0, %v3874_v17  ;;  %3356 = vmatprep.subr.bf16.mxu0 %v3874_v17 }
  0x88   :  { %v3090_v28 = vsel %vm73_vm5, 1.0, %v3874_v17 }
  0x89   :  { %3351 = vmatprep.mubr.msk.f32.mxu1 %vm170_vm3, %v3090_v28 }
  0x8a   :  { %3352 = vmatmul.mubr.msk.f32.vlgmr.msra.gmra.mrb[0].mxu1 %vm170_vm3, %v3091_v27  ;;  %3357 = vmatpush3.bf16.msra.mxu0 %v3728_v51 }
  0x8b   :  { %3370 = vmatprep.mubr.msk.bf16.mxu1 %vm3875_vm7, %v3874_v17  ;;  %3362 = vmatprep.subr.bf16.mxu0 %v3874_v17 }
 0x158   :  { %v3348_v29 = vpop.f32.mrb[0].mxu0 }
 0x159   :  { %v160_v30 = vpop.f32.mrb[1].mxu0 }
 0x15d   :  { %v3353_v31 = vpop.f32.mrb[0].mxu1 }
 0x15e   :  { %v254_v33 = vadd.f32 %v3353_v31, %v3348_v29  ;;  %v243_v34 = vpop.f32.mrb[1].mxu1 }
 0x15f   :  { %v253_v35 = vadd.f32 %v243_v34, %v160_v30 }
 0x160   :  { %v256_v36 = vadd.f32 %v254_v33, %v252_v32 }
 0x161   :  { %v255_v37 = vadd.f32 %v253_v35, %v252_v32 }
 0x162   :  { %v263_v38 = vsel %vm259_vm6, %v256_v36, 0.0 }
 0x163   :  { %264 = vadd.xlane.f32.xlu1 %v263_v38  ;;  %v260_v39 = vsel %vm259_vm6, %v255_v37, 0.0 }
 0x164   :  { %261 = vadd.xlane.f32.xlu0 %v260_v39 }
 0x1f0   :  { %v265_v40 = vpop.xlane.xlu1 %264 }
 0x1f1   :  { %v268_v41 = vmul.f32 0.03125, %v265_v40  ;;  %v262_v42 = vpop.xlane.xlu0 %261 }
 0x1f2   :  { %v267_v43 = vmul.f32 0.03125, %v262_v42 }
 0x1f3   :  { %v270_v44 = vsub.f32 %v256_v36, %v268_v41 }
 0x1f4   :  { %v269_v45 = vsub.f32 %v255_v37, %v267_v43 }
 0x1f5   :  { %v272_v48 = vmul.f32 %v270_v44, %v270_v44 }
 0x1f6   :  { %v271_v46 = vmul.f32 %v269_v45, %v269_v45 }
 0x1f7   :  { %v276_v49 = vsel %vm259_vm6, %v272_v48, 0.0 }
 0x1f8   :  { %v273_v47 = vsel %vm259_vm6, %v271_v46, 0.0 }
 0x1f9   :  { %274 = vadd.xlane.f32.xlu0 %v273_v47 }
 0x1fd   :  { %277 = vadd.xlane.f32.xlu0 %v276_v49 }
 0x286   :  { %v275_v52 = vpop.xlane.xlu0 %274 }
 0x287   :  { %v279_v53 = vmul.f32 0.03125, %v275_v52 }
 0x289   :  { %v281_v54 = vadd.f32 1e-12, %v279_v53  ;;  %v3112_v53 = vld [vmem:[%s4654_s2 + $0x1] ss:$0 sm:$0xff] }
 0x28a   :  { %v278_v55 = vpop.xlane.xlu0 %277 }
 0x28b   :  { %3755 = vrsqrt.f32 %v281_v54  ;;  %v280_v56 = vmul.f32 0.03125, %v278_v55 }
 0x28d   :  { %v282_v57 = vadd.f32 1e-12, %v280_v56 }
 0x28f   :  { %3757 = vrsqrt.f32 %v282_v57 }
 0x295   :  { %v3756_v58 = vpop.eup %3755 }
 0x296   :  { %v285_v59 = vmul.f32 %v3756_v58, %v269_v45 }
 0x298   :  { %v291_v62 = vmul.f32 %v3096_v60, %v285_v59 }
 0x299   :  { %v3758_v61 = vpop.eup %3757 }
 0x29a   :  { %v286_v63 = vmul.f32 %v3758_v61, %v270_v44  ;;  %v4034_v2 = vadd.f32 %v3097_v0, %v291_v62 }
 0x29c   :  { %v292_v1 = vmul.f32 %v3096_v60, %v286_v63  ;;  %v3111_v60 = vld [vmem:[%s4654_s2] ss:$0 sm:$0xff] }
 0x29e   :  { %v4036_v3 = vadd.f32 %v3097_v0, %v292_v1 }
 0x2a0   :  { %v3209_v4 = vpack.c.bf16 %v4036_v3, %v4034_v2 }
 0x2a2   :  { %3359 = vmatmul.mubr.msk.bf16.vlgmr.msra.gmra.mrb[4].mxu0 %vm259_vm6, %v3209_v4 }
 0x2a3   :  { %3364 = vmatprep.mubr.msk.bf16.mxu0 %vm3875_vm7, %v3874_v17 }
 0x375   :  { %v394_v6 = vpop.f32.mrb[4].mxu0 }
 0x376   :  { %v3360_v7 = vpop.f32.mrb[5].mxu0  ;;  %v395_v9 = vadd.f32 %v3098_v5, %v394_v6 }
 0x377   :  { %v397_v8 = vpop.f32.mrb[6].mxu0 }
 0x378   :  { %v398_v10 = vadd.f32 %v3098_v5, %v397_v8  ;;  %v3361_v11 = vpop.f32.mrb[7].mxu0  ;;  %v421_v14 = vpack.c.bf16 %v395_v9, %v395_v9 }
 0x37a   :  { %v3672_v12 = vpack.i.bf16 %v398_v10, %v395_v9  ;;  %v422_v13 = vpack.c.bf16 %v398_v10, %v398_v10 }
 0x37c   :  { %3673 = vrot.lane.b32.xlu0 %v3672_v12, %s3876_s6  ;;  %3668 = vrot.lane.b32.xlu1 %v3672_v12, %s3877_s29 }
 0x380   :  { %3678 = vrot.lane.b32.xlu1 %v3672_v12, %s3878_s30  ;;  %479 = vrot.lane.b32.xlu0 %v422_v13, %s3879_s15 }
 0x384   :  { %430 = vrot.lane.b32.xlu1 %v421_v14, %s3879_s15 }
 0x3ee   :  { %v3674_v15 = vpop.permute.xlu0 %3673  ;;  %v3669_v16 = vpop.permute.xlu1 %3668 }
 0x3ef   :  { %v3671_v18 = vunpack.i.h.bf16 %v3669_v16  ;;  %v3670_v20 = vunpack.i.l.bf16 %v3669_v16  ;;  %v3676_v21 = vunpack.i.h.bf16 %v3674_v15  ;;  %v3675_v22 = vunpack.i.l.bf16 %v3674_v15 }
 0x3f1   :  { %v4051_v23 = vpack.c.bf16 %v3671_v18, %v3671_v18  ;;  %v4053_v24 = vpack.c.bf16 %v3670_v20, %v3670_v20  ;;  %v4060_v28 = vpack.c.bf16 %v3676_v21, %v3676_v21  ;;  %v4062_v29 = vpack.c.bf16 %v3675_v22, %v3675_v22 }
 0x3f2   :  { %v3679_v25 = vpop.permute.xlu1 %3678  ;;  %v480_v26 = vpop.permute.xlu0 %479 }
 0x3f3   :  { %v485_v27 = vsel %vm170_vm3, %v480_v26, 0  ;;  %528 = vrot.lane.b32.xlu1 %v4053_v24, %s3879_s15  ;;  %577 = vrot.lane.b32.xlu0 %v4051_v23, %s3879_s15  ;;  %v3681_v30 = vunpack.i.h.bf16 %v3679_v25  ;;  %v3680_v31 = vunpack.i.l.bf16 %v3679_v25 }
 0x3f4   :  { %3369 = vmatpush3.bf16.xpose.msra.mxu1 %v485_v27 }
 0x3f5   :  { %3380 = vmatprep.subr.bf16.mxu1 %v3874_v17  ;;  %v4070_v34 = vpack.c.bf16 %v3681_v30, %v3681_v30  ;;  %v4072_v35 = vpack.c.bf16 %v3680_v31, %v3680_v31 }
 0x3f6   :  { %v431_v32 = vpop.permute.xlu1 %430 }
 0x3f7   :  { %v436_v33 = vsel %vm170_vm3, %v431_v32, 0  ;;  %626 = vrot.lane.b32.xlu1 %v4062_v29, %s3879_s15  ;;  %675 = vrot.lane.b32.xlu0 %v4060_v28, %s3879_s15 }
 0x3f8   :  { %3363 = vmatpush3.bf16.xpose.msra.mxu0 %v436_v33 }
 0x3f9   :  { %3374 = vmatprep.subr.bf16.mxu0 %v3874_v17 }
 0x3fb   :  { %724 = vrot.lane.b32.xlu1 %v4072_v35, %s3879_s15  ;;  %773 = vrot.lane.b32.xlu0 %v4070_v34, %s3879_s15 }
 0x3fc   :  { %3371 = vmatmul.mubr.msk.bf16.vlgmr.msra.gmra.mrb[4].mxu1 %vm170_vm3, %v422_v13 }
 0x3fd   :  { %3382 = vmatprep.mubr.msk.bf16.mxu1 %vm3875_vm7, %v3874_v17 }
 0x3ff   :  { %3365 = vmatmul.mubr.msk.bf16.vlgmr.msra.gmra.mrb[8].mxu0 %vm170_vm3, %v421_v14  ;;  %994 = vrot.lane.b32.xlu1 %v422_v13, %s3880_s16 }
 0x400   :  { %945 = vrot.lane.b32.xlu0 %v421_v14, %s3880_s16  ;;  %3376 = vmatprep.mubr.msk.bf16.mxu0 %vm3875_vm7, %v3874_v17 }
 0x465   :  { %v529_v36 = vpop.permute.xlu1 %528  ;;  %v578_v37 = vpop.permute.xlu0 %577 }
 0x466   :  { %v534_v38 = vsel %vm170_vm3, %v529_v36, 0  ;;  %v583_v39 = vsel %vm170_vm3, %v578_v37, 0 }
 0x467   :  { %3375 = vmatpush3.bf16.xpose.msra.mxu0 %v534_v38  ;;  %3381 = vmatpush3.bf16.xpose.msra.mxu1 %v583_v39 }
 0x468   :  { %3386 = vmatprep.subr.bf16.mxu0 %v3874_v17  ;;  %3392 = vmatprep.subr.bf16.mxu1 %v3874_v17 }
 0x469   :  { %v627_v40 = vpop.permute.xlu1 %626  ;;  %v676_v41 = vpop.permute.xlu0 %675 }
 0x46a   :  { %v632_v42 = vsel %vm170_vm3, %v627_v40, 0  ;;  %v681_v43 = vsel %vm170_vm3, %v676_v41, 0 }
 0x46d   :  { %v725_v44 = vpop.permute.xlu1 %724  ;;  %v774_v45 = vpop.permute.xlu0 %773 }
 0x46e   :  { %3377 = vmatmul.mubr.msk.bf16.vlgmr.msra.gmra.mrb[12].mxu0 %vm170_vm3, %v4053_v24  ;;  %3383 = vmatmul.mubr.msk.bf16.vlgmr.msra.gmra.mrb[8].mxu1 %vm170_vm3, %v4051_v23  ;;  %v730_v46 = vsel %vm170_vm3, %v725_v44, 0  ;;  %v779_v47 = vsel %vm170_vm3, %v774_v45, 0 }
 0x46f   :  { %3387 = vmatpush3.bf16.xpose.msra.mxu0 %v632_v42  ;;  %3393 = vmatpush3.bf16.xpose.msra.mxu1 %v681_v43 }
 0x470   :  { %3388 = vmatprep.mubr.msk.bf16.mxu0 %vm3875_vm7, %v3874_v17  ;;  %3394 = vmatprep.mubr.msk.bf16.mxu1 %vm3875_vm7, %v3874_v17 }
 0x471   :  { %3398 = vmatprep.subr.bf16.mxu0 %v3874_v17  ;;  %3404 = vmatprep.subr.bf16.mxu1 %v3874_v17  ;;  %v995_v48 = vpop.permute.xlu1 %994 }
 0x472   :  { %v946_v49 = vpop.permute.xlu0 %945  ;;  %v1000_v50 = vsel %vm950_vm8, %v995_v48, 0 }
 0x473   :  { %v952_v51 = vsel %vm950_vm8, %v946_v49, 0 }
 0x476   :  { %3389 = vmatmul.mubr.msk.bf16.vlgmr.msra.gmra.mrb[16].mxu0 %vm170_vm3, %v4062_v29  ;;  %3395 = vmatmul.mubr.msk.bf16.vlgmr.msra.gmra.mrb[12].mxu1 %vm170_vm3, %v4060_v28 }
 0x477   :  { %3399 = vmatpush3.bf16.xpose.msra.mxu0 %v730_v46  ;;  %3405 = vmatpush3.bf16.xpose.msra.mxu1 %v779_v47 }
 0x478   :  { %3400 = vmatprep.mubr.msk.bf16.mxu0 %vm3875_vm7, %v3874_v17  ;;  %3406 = vmatprep.mubr.msk.bf16.mxu1 %vm3875_vm7, %v3874_v17 }
 0x479   :  { %3410 = vmatprep.subr.bf16.mxu0 %v3874_v17  ;;  %3416 = vmatprep.subr.bf16.mxu1 %v3874_v17 }
 0x47e   :  { %3401 = vmatmul.mubr.msk.bf16.vlgmr.msra.gmra.mrb[20].mxu0 %vm170_vm3, %v4072_v35  ;;  %3407 = vmatmul.mubr.msk.bf16.vlgmr.msra.gmra.mrb[16].mxu1 %vm170_vm3, %v4070_v34 }
 0x47f   :  { %3411 = vmatpush3.bf16.msra.mxu0 %v952_v51  ;;  %3417 = vmatpush3.bf16.msra.mxu1 %v1000_v50 }
 0x480   :  { %3412 = vmatprep.mubr.msk.bf16.mxu0 %vm3875_vm7, %v3874_v17  ;;  %3418 = vmatprep.mubr.msk.bf16.mxu1 %vm3875_vm7, %v3874_v17 }
 0x481   :  { %3422 = vmatprep.subr.bf16.mxu0 %v3874_v17  ;;  %3428 = vmatprep.subr.bf16.mxu1 %v3874_v17 }
 0x4cf   :  { %v521_v52 = vpop.f32.mrb[4].mxu1 }
 0x4d0   :  { %v822_v54 = vmul.f32 0.35355338, %v521_v52  ;;  %v3372_v55 = vpop.f32.mrb[5].mxu1 }
 0x4d1   :  { %v524_v56 = vpop.f32.mrb[6].mxu1 }
 0x4d2   :  { %v3373_v57 = vpop.f32.mrb[7].mxu1  ;;  %v472_v58 = vpop.f32.mrb[8].mxu0  ;;  %v4130_v59 = vadd.f32 %v3112_v53, %v822_v54 }
 0x4d3   :  { %v821_v61 = vmul.f32 0.35355338, %v472_v58  ;;  %v3366_v62 = vpop.f32.mrb[9].mxu0 }
 0x4d4   :  { %v852_v63 = vsel %vm170_vm3, %v4130_v59, -inf  ;;  %v475_v0 = vpop.f32.mrb[10].mxu0 }
 0x4d5   :  { %853 = vmax.xlane.f32.xlu0 %v852_v63  ;;  %v3367_v1 = vpop.f32.mrb[11].mxu0  ;;  %v841_v4 = vadd.f32 %v3111_v60, %v821_v61 }
 0x4d7   :  { %v849_v5 = vsel %vm170_vm3, %v841_v4, -inf }
 0x4d8   :  { %850 = vmax.xlane.f32.xlu1 %v849_v5 }
 0x541   :  { %v570_v6 = vpop.f32.mrb[12].mxu0  ;;  %v619_v7 = vpop.f32.mrb[8].mxu1 }
 0x542   :  { %v823_v8 = vmul.f32 0.35355338, %v570_v6  ;;  %v824_v9 = vmul.f32 0.35355338, %v619_v7  ;;  %v3378_v10 = vpop.f32.mrb[13].mxu0  ;;  %v3384_v11 = vpop.f32.mrb[9].mxu1 }
 0x543   :  { %v573_v12 = vpop.f32.mrb[14].mxu0  ;;  %v622_v13 = vpop.f32.mrb[10].mxu1 }
 0x544   :  { %v3379_v14 = vpop.f32.mrb[15].mxu0  ;;  %v3385_v15 = vpop.f32.mrb[11].mxu1  ;;  %v844_v16 = vadd.f32 %v3112_v53, %v824_v9  ;;  %v843_v18 = vadd.f32 %v3111_v60, %v823_v8 }
 0x546   :  { %v858_v20 = vsel %vm170_vm3, %v844_v16, -inf  ;;  %v855_v21 = vsel %vm170_vm3, %v843_v18, -inf }
 0x547   :  { %859 = vmax.xlane.f32.xlu1 %v858_v20  ;;  %856 = vmax.xlane.f32.xlu0 %v855_v21 }
 0x549   :  { %v668_v22 = vpop.f32.mrb[16].mxu0  ;;  %v717_v25 = vpop.f32.mrb[12].mxu1 }
 0x54a   :  { %v825_v26 = vmul.f32 0.35355338, %v668_v22  ;;  %v826_v27 = vmul.f32 0.35355338, %v717_v25  ;;  %v3390_v30 = vpop.f32.mrb[17].mxu0  ;;  %v3396_v31 = vpop.f32.mrb[13].mxu1 }
 0x54b   :  { %v671_v32 = vpop.f32.mrb[18].mxu0  ;;  %v720_v33 = vpop.f32.mrb[14].mxu1 }
 0x54c   :  { %v3391_v36 = vpop.f32.mrb[19].mxu0  ;;  %v3397_v37 = vpop.f32.mrb[15].mxu1  ;;  %v846_v38 = vadd.f32 %v3112_v53, %v826_v27  ;;  %v4140_v39 = vadd.f32 %v3111_v60, %v825_v26 }
 0x54e   :  { %v864_v40 = vsel %vm170_vm3, %v846_v38, -inf  ;;  %v861_v41 = vsel %vm170_vm3, %v4140_v39, -inf }
 0x54f   :  { %865 = vmax.xlane.f32.xlu1 %v864_v40  ;;  %862 = vmax.xlane.f32.xlu0 %v861_v41 }
 0x551   :  { %v766_v42 = vpop.f32.mrb[20].mxu0  ;;  %v815_v43 = vpop.f32.mrb[16].mxu1 }
 0x552   :  { %v827_v44 = vmul.f32 0.35355338, %v766_v42  ;;  %v828_v45 = vmul.f32 0.35355338, %v815_v43  ;;  %v3402_v46 = vpop.f32.mrb[21].mxu0  ;;  %v3408_v47 = vpop.f32.mrb[17].mxu1 }
 0x553   :  { %v769_v48 = vpop.f32.mrb[22].mxu0  ;;  %v818_v49 = vpop.f32.mrb[18].mxu1 }
 0x554   :  { %v3403_v50 = vpop.f32.mrb[23].mxu0  ;;  %v3409_v51 = vpop.f32.mrb[19].mxu1  ;;  %v848_v52 = vadd.f32 %v3112_v53, %v828_v45  ;;  %v847_v54 = vadd.f32 %v3111_v60, %v827_v44 }
 0x556   :  { %v870_v55 = vsel %vm170_vm3, %v848_v52, -inf  ;;  %v867_v56 = vsel %vm170_vm3, %v847_v54, -inf }
 0x557   :  { %871 = vmax.xlane.f32.xlu1 %v870_v55  ;;  %868 = vmax.xlane.f32.xlu0 %v867_v56 }
 0x562   :  { %v854_v57 = vpop.xlane.xlu0 %853 }
 0x563   :  { %v874_v61 = vsub.f32 %v4130_v59, %v854_v57 }
 0x565   :  { %v851_v58 = vpop.xlane.xlu1 %850  ;;  %v883_v63 = vmul.f32 1.442695, %v874_v61 }
 0x566   :  { %v873_v62 = vsub.f32 %v841_v4, %v851_v58 }
 0x567   :  { %3759 = vpow2.f32 %v883_v63 }
 0x568   :  { %1042 = vrot.lane.b32.xlu1 %v4053_v24, %s3880_s16  ;;  %v881_v53 = vmul.f32 1.442695, %v873_v62 }
 0x56a   :  { %3761 = vpow2.f32 %v881_v53 }
 0x56d   :  { %1090 = vrot.lane.b32.xlu0 %v4051_v23, %s3880_s16 }
 0x571   :  { %v3760_v60 = vpop.eup %3759 }
 0x572   :  { %v900_v1 = vsel %vm170_vm3, %v3760_v60, 0.0 }
 0x574   :  { %v3762_v0 = vpop.eup %3761 }
 0x575   :  { %v897_v5 = vsel %vm170_vm3, %v3762_v0, 0.0 }
 0x58c   :  { %901 = vadd.xlane.f32.xlu1 %v900_v1  ;;  %898 = vadd.xlane.f32.xlu0 %v897_v5 }
 0x59d   :  { %1138 = vrot.lane.b32.xlu1 %v4062_v29, %s3880_s16 }
 0x5d4   :  { %v860_v23 = vpop.xlane.xlu1 %859  ;;  %v857_v24 = vpop.xlane.xlu0 %856 }
 0x5d5   :  { %v876_v6 = vsub.f32 %v844_v16, %v860_v23  ;;  %v875_v59 = vsub.f32 %v843_v18, %v857_v24 }
 0x5d7   :  { %v887_v4 = vmul.f32 1.442695, %v876_v6  ;;  %v885_v7 = vmul.f32 1.442695, %v875_v59 }
 0x5d9   :  { %3763 = vpow2.f32 %v887_v4 }
 0x5da   :  { %3765 = vpow2.f32 %v885_v7 }
 0x5dc   :  { %v866_v8 = vpop.xlane.xlu1 %865  ;;  %v863_v25 = vpop.xlane.xlu0 %862 }
 0x5dd   :  { %v878_v9 = vsub.f32 %v846_v38, %v866_v8  ;;  %v877_v26 = vsub.f32 %v4140_v39, %v863_v25 }
 0x5df   :  { %v891_v10 = vmul.f32 1.442695, %v878_v9  ;;  %v889_v30 = vmul.f32 1.442695, %v877_v26 }
 0x5e1   :  { %3767 = vpow2.f32 %v891_v10 }
 0x5e3   :  { %v4156_v11 = vpop.eup %3763 }
 0x5e4   :  { %v4158_v12 = vpop.eup %3765  ;;  %v872_v13 = vpop.xlane.xlu1 %871  ;;  %v906_v29 = vsel %vm170_vm3, %v4156_v11, 0.0 }
 0x5e5   :  { %v880_v14 = vsub.f32 %v848_v52, %v872_v13  ;;  %907 = vadd.xlane.f32.xlu1 %v906_v29  ;;  %v903_v15 = vsel %vm170_vm3, %v4158_v12, 0.0  ;;  %v869_v27 = vpop.xlane.xlu0 %868 }
 0x5e6   :  { %904 = vadd.xlane.f32.xlu0 %v903_v15  ;;  %v879_v31 = vsub.f32 %v847_v54, %v869_v27 }
 0x5e7   :  { %v895_v16 = vmul.f32 1.442695, %v880_v14 }
 0x5e8   :  { %v893_v32 = vmul.f32 1.442695, %v879_v31  ;;  %v1043_v33 = vpop.permute.xlu1 %1042 }
 0x5e9   :  { %3769 = vpow2.f32 %v895_v16  ;;  %v1091_v36 = vpop.permute.xlu0 %1090  ;;  %v1048_v48 = vsel %vm950_vm8, %v1043_v33, 0 }
 0x5ea   :  { %3771 = vpow2.f32 %v889_v30  ;;  %v1096_v47 = vsel %vm950_vm8, %v1091_v36, 0 }
 0x5eb   :  { %v4164_v18 = vpop.eup %3767  ;;  %3773 = vpow2.f32 %v893_v32 }
 0x5ec   :  { %v912_v20 = vsel %vm170_vm3, %v4164_v18, 0.0 }
 0x5ed   :  { %913 = vadd.xlane.f32.xlu1 %v912_v20 }
 0x5f3   :  { %v4168_v21 = vpop.eup %3769 }
 0x5f4   :  { %v918_v22 = vsel %vm170_vm3, %v4168_v21, 0.0  ;;  %v4177_v37 = vpop.eup %3771 }
 0x5f5   :  { %919 = vadd.xlane.f32.xlu1 %v918_v22  ;;  %v4181_v39 = vpop.eup %3773 }
 0x5fc   :  { %1186 = vrot.lane.b32.xlu0 %v4060_v28, %s3880_s16  ;;  %v909_v28 = vsel %vm170_vm3, %v4177_v37, 0.0 }
 0x606   :  { %1234 = vrot.lane.b32.xlu1 %v4072_v35, %s3880_s16  ;;  %v915_v35 = vsel %vm170_vm3, %v4181_v39, 0.0 }
 0x619   :  { %v902_v38 = vpop.xlane.xlu1 %901  ;;  %v899_v40 = vpop.xlane.xlu0 %898 }
 0x61a   :  { %3775 = vrcp.f32 %v902_v38 }
 0x61b   :  { %3777 = vrcp.f32 %v899_v40  ;;  %910 = vadd.xlane.f32.xlu0 %v909_v28 }
 0x61d   :  { %v1139_v49 = vpop.permute.xlu1 %1138 }
 0x61f   :  { %916 = vadd.xlane.f32.xlu0 %v915_v35 }
 0x624   :  { %v3776_v41 = vpop.eup %3775 }
 0x625   :  { %v3778_v42 = vpop.eup %3777  ;;  %v930_v43 = vmul.f32 %v3776_v41, %v3760_v60 }
 0x626   :  { %v929_v44 = vmul.f32 %v3778_v42, %v3762_v0  ;;  %v3729_v42 = vld [vmem:[%s4661_s9] sm:$0xff]  }
 0x627   :  { %v938_v45 = vpack.c.bf16 %v930_v43, %v930_v43 }
 0x628   :  { %v937_v46 = vpack.c.bf16 %v929_v44, %v929_v44 }
 0x629   :  { %3419 = vmatmul.mubr.msk.bf16.vlgmr.msra.gmra.mrb[20].mxu1 %vm170_vm3, %v938_v45 }
 0x62a   :  { %3413 = vmatmul.mubr.msk.bf16.vlgmr.msra.gmra.mrb[24].mxu0 %vm170_vm3, %v937_v46  ;;  %3429 = vmatpush3.bf16.msra.mxu1 %v1096_v47  ;;  %v3730_v46 = vld [vmem:[%s4661_s9 + $0x8] sm:$0xff]  }
 0x62b   :  { %3423 = vmatpush3.bf16.msra.mxu0 %v1048_v48  ;;  %3424 = vmatprep.mubr.msk.bf16.mxu0 %vm3875_vm7, %v3874_v17 }
 0x62c   :  { %3430 = vmatprep.mubr.msk.bf16.mxu1 %vm3875_vm7, %v3874_v17  ;;  %3434 = vmatprep.subr.bf16.mxu0 %v3874_v17 }
 0x62d   :  { %3440 = vmatprep.subr.bf16.mxu1 %v3874_v17 }
 0x635   :  { %1282 = vrot.lane.b32.xlu0 %v4070_v34, %s3880_s16  ;;  %v1144_v34 = vsel %vm950_vm8, %v1139_v49, 0 }
 0x672   :  { %v908_v50 = vpop.xlane.xlu1 %907 }
 0x673   :  { %3779 = vrcp.f32 %v908_v50  ;;  %v905_v51 = vpop.xlane.xlu0 %904 }
 0x674   :  { %3781 = vrcp.f32 %v905_v51 }
 0x677   :  { %v1187_v58 = vpop.permute.xlu0 %1186 }
 0x678   :  { %v1192_v63 = vsel %vm950_vm8, %v1187_v58, 0 }
 0x67a   :  { %v914_v52 = vpop.xlane.xlu1 %913 }
 0x67b   :  { %3783 = vrcp.f32 %v914_v52 }
 0x67d   :  { %v3780_v54 = vpop.eup %3779 }
 0x67e   :  { %v3782_v55 = vpop.eup %3781  ;;  %v932_v56 = vmul.f32 %v3780_v54, %v4156_v11 }
 0x67f   :  { %v931_v57 = vmul.f32 %v3782_v55, %v4158_v12 }
 0x680   :  { %v940_v61 = vpack.c.bf16 %v932_v56, %v932_v56 }
 0x681   :  { %v939_v62 = vpack.c.bf16 %v931_v57, %v931_v57 }
 0x682   :  { %3431 = vmatmul.mubr.msk.bf16.vlgmr.msra.gmra.mrb[24].mxu1 %vm170_vm3, %v940_v61  ;;  %v920_v1 = vpop.xlane.xlu1 %919 }
 0x683   :  { %3425 = vmatmul.mubr.msk.bf16.vlgmr.msra.gmra.mrb[28].mxu0 %vm170_vm3, %v939_v62  ;;  %3441 = vmatpush3.bf16.msra.mxu1 %v1192_v63  ;;  %3785 = vrcp.f32 %v920_v1 }
 0x684   :  { %3435 = vmatpush3.bf16.msra.mxu0 %v1144_v34  ;;  %3442 = vmatprep.mubr.msk.bf16.mxu1 %vm3875_vm7, %v3874_v17 }
 0x685   :  { %v3784_v53 = vpop.eup %3783  ;;  %3452 = vmatprep.subr.bf16.mxu1 %v3874_v17  ;;  %3436 = vmatprep.mubr.msk.bf16.mxu0 %vm3875_vm7, %v3874_v17 }
 0x686   :  { %v934_v60 = vmul.f32 %v3784_v53, %v4164_v18  ;;  %3446 = vmatprep.subr.bf16.mxu0 %v3874_v17  ;;  %v1235_v10 = vpop.permute.xlu1 %1234 }
 0x687   :  { %v1240_v13 = vsel %vm950_vm8, %v1235_v10, 0 }
 0x688   :  { %v942_v0 = vpack.c.bf16 %v934_v60, %v934_v60 }
 0x68a   :  { %3443 = vmatmul.mubr.msk.bf16.vlgmr.msra.gmra.mrb[28].mxu1 %vm170_vm3, %v942_v0 }
 0x68b   :  { %3454 = vmatprep.mubr.msk.bf16.mxu1 %vm3875_vm7, %v3874_v17 }
 0x68d   :  { %v3786_v23 = vpop.eup %3785 }
 0x68e   :  { %v936_v6 = vmul.f32 %v3786_v23, %v4168_v21 }
 0x690   :  { %v944_v8 = vpack.c.bf16 %v936_v6, %v936_v6 }
 0x6a8   :  { %v911_v5 = vpop.xlane.xlu0 %910 }
 0x6a9   :  { %3787 = vrcp.f32 %v911_v5 }
 0x6ac   :  { %v917_v24 = vpop.xlane.xlu0 %916 }
 0x6ad   :  { %3789 = vrcp.f32 %v917_v24 }
 0x6b0   :  { %v1283_v59 = vpop.permute.xlu0 %1282 }
 0x6b1   :  { %v1288_v4 = vsel %vm950_vm8, %v1283_v59, 0 }
 0x6b2   :  { %3453 = vmatpush3.bf16.msra.mxu1 %v1288_v4 }
 0x6b3   :  { %v3788_v7 = vpop.eup %3787  ;;  %3466 = vmatprep.subr.bf16.mxu1 %v3874_v17 }
 0x6b4   :  { %v933_v9 = vmul.f32 %v3788_v7, %v4177_v37 }
 0x6b5   :  { %3455 = vmatmul.mubr.msk.bf16.vlgmr.msra.gmra.mrb[32].mxu1 %vm170_vm3, %v944_v8 }
 0x6b6   :  { %v941_v11 = vpack.c.bf16 %v933_v9, %v933_v9  ;;  %3470 = vmatprep.mubr.msk.bf16.mxu1 %vm3875_vm7, %v3874_v17  ;;  %v4250_v9 = vshrl.u32 %v53_v19, 7 }
 0x6b7   :  { %v3790_v12 = vpop.eup %3789 }
 0x6b8   :  { %3437 = vmatmul.mubr.msk.bf16.vlgmr.msra.gmra.mrb[32].mxu0 %vm170_vm3, %v941_v11  ;;  %v935_v29 = vmul.f32 %v3790_v12, %v4181_v39  ;;  %v1366_v10 = vsub.s32 0, %v4250_v9  ;;  %v4256_v11 = vld [vmem:[%s4665_s13] sm:$0xff] }
 0x6b9   :  { %3447 = vmatpush3.bf16.msra.mxu0 %v1240_v13  ;;  %3448 = vmatprep.mubr.msk.bf16.mxu0 %vm3875_vm7, %v3874_v17 }
 0x6ba   :  { %3458 = vmatprep.subr.bf16.mxu0 %v3874_v17  ;;  %v943_v14 = vpack.c.bf16 %v935_v29, %v935_v29  ;;  %v1367_v12 = vrot.slane %v4256_v11, %v1366_v10 }
 0x6c0   :  { %3449 = vmatmul.mubr.msk.bf16.vlgmr.msra.gmra.mrb[36].mxu0 %vm170_vm3, %v943_v14 }
 0x6c1   :  { %3462 = vmatprep.mubr.msk.bf16.mxu0 %vm3875_vm7, %v3874_v17  ;;  %3459 = vmatpush3.bf16.msra.mxu0 %v3729_v42 }
 0x6c2   :  { %3460 = vmatprep.subr.bf16.mxu0 %v3874_v17 }
 0x6c5   :  { %3461 = vmatpush3.bf16.msra.mxu0 %v3730_v46 }
 0x6c6   :  { %3474 = vmatprep.subr.bf16.mxu0 %v3874_v17 }
 0x6fc   :  { %v1036_v15 = vpop.f32.mrb[20].mxu1 }
 0x6fd   :  { %v988_v16 = vpop.f32.mrb[24].mxu0  ;;  %v3420_v18 = vpop.f32.mrb[21].mxu1 }
 0x6fe   :  { %v3414_v20 = vpop.f32.mrb[25].mxu0  ;;  %v1039_v21 = vpop.f32.mrb[22].mxu1 }
 0x6ff   :  { %v991_v22 = vpop.f32.mrb[26].mxu0  ;;  %v3421_v25 = vpop.f32.mrb[23].mxu1 }
 0x700   :  { %v3415_v26 = vpop.f32.mrb[27].mxu0 }
 0x755   :  { %v1132_v27 = vpop.f32.mrb[24].mxu1 }
 0x756   :  { %v1084_v30 = vpop.f32.mrb[28].mxu0  ;;  %v3432_v31 = vpop.f32.mrb[25].mxu1 }
 0x757   :  { %v3682_v32 = vpack.i.bf16 %v1132_v27, %v1084_v30  ;;  %v3426_v33 = vpop.f32.mrb[29].mxu0  ;;  %v1135_v36 = vpop.f32.mrb[26].mxu1 }
 0x758   :  { %v1087_v37 = vpop.f32.mrb[30].mxu0  ;;  %v3433_v38 = vpop.f32.mrb[27].mxu1 }
 0x759   :  { %3683 = vrot.lane.b32.xlu1 %v3682_v32, %s3881_s20  ;;  %v3427_v40 = vpop.f32.mrb[31].mxu0  ;;  %v3732_v38 = vld [vmem:[%s4662_s10 + $0x8] sm:$0xff]  }
 0x75a   :  { %v3733_v40 = vld [vmem:[%s4664_s12] sm:$0xff]  }
 0x75d   :  { %v1228_v28 = vpop.f32.mrb[28].mxu1 }
 0x75e   :  { %v3444_v39 = vpop.f32.mrb[29].mxu1 }
 0x75f   :  { %v1231_v35 = vpop.f32.mrb[30].mxu1 }
 0x760   :  { %v3445_v41 = vpop.f32.mrb[31].mxu1 }
 0x788   :  { %v1324_v43 = vpop.f32.mrb[32].mxu1 }
 0x789   :  { %v3456_v44 = vpop.f32.mrb[33].mxu1 }
 0x78a   :  { %v1327_v45 = vpop.f32.mrb[34].mxu1 }
 0x78b   :  { %v1180_v47 = vpop.f32.mrb[32].mxu0  ;;  %v3457_v48 = vpop.f32.mrb[35].mxu1  ;;  %v1459_v45 = vsub.s32 1, %v4250_v9 }
 0x78c   :  { %v3687_v49 = vpack.i.bf16 %v1228_v28, %v1180_v47  ;;  %v3438_v50 = vpop.f32.mrb[33].mxu0  ;;  %v3734_v28 = vld [vmem:[%s4664_s12 + $0x8] sm:$0xff]  }
 0x78d   :  { %v1183_v51 = vpop.f32.mrb[34].mxu0  ;;  %v1460_v47 = vrot.slane %v4256_v11, %v1459_v45 }
 0x78e   :  { %3688 = vrot.lane.b32.xlu0 %v3687_v49, %s3882_s22  ;;  %v3439_v52 = vpop.f32.mrb[35].mxu0  ;;  %v1465_v49 = vsub.s32 2, %v4250_v9 }
 0x793   :  { %v1276_v54 = vpop.f32.mrb[36].mxu0 }
 0x794   :  { %v3692_v55 = vpack.i.bf16 %v1324_v43, %v1276_v54  ;;  %v3450_v56 = vpop.f32.mrb[37].mxu0  ;;  %v1466_v54 = vrot.slane %v4256_v11, %v1465_v49 }
 0x795   :  { %v1279_v57 = vpop.f32.mrb[38].mxu0 }
 0x796   :  { %3693 = vrot.lane.b32.xlu1 %v3692_v55, %s3883_s23  ;;  %v3451_v58 = vpop.f32.mrb[39].mxu0 }
 0x7cb   :  { %v3684_v61 = vpop.permute.xlu1 %3683 }
 0x7cc   :  { %v3686_v63 = vunpack.i.h.bf16 %v3684_v61  ;;  %v3685_v34 = vunpack.i.l.bf16 %v3684_v61  ;;  %v3735_v61 = vld [vmem:[%s4664_s12 + $0x10] sm:$0xff]  }
 0x7ce   :  { %v1355_v1 = vsel %vm170_vm3, %v1036_v15, %v3686_v63  ;;  %v1354_v5 = vsel %vm170_vm3, %v988_v16, %v3685_v34  ;;  %v3737_v63 = vld [vmem:[%s4664_s12 + $0x20] sm:$0xff]   ;;  %v3738_v34 = vld [vmem:[%s4664_s12 + $0x28] sm:$0xff]  }
 0x800   :  { %v3689_v62 = vpop.permute.xlu0 %3688 }
 0x801   :  { %v3691_v53 = vunpack.i.h.bf16 %v3689_v62  ;;  %v3690_v60 = vunpack.i.l.bf16 %v3689_v62  ;;  %v3736_v62 = vld [vmem:[%s4664_s12 + $0x18] sm:$0xff]  }
 0x803   :  { %v1358_v6 = vsel %vm1356_vm9, %v1355_v1, %v3691_v53  ;;  %v1357_v59 = vsel %vm1356_vm9, %v1354_v5, %v3690_v60  ;;  %v3739_v53 = vld [vmem:[%s4664_s12 + $0x30] sm:$0xff]   ;;  %v3740_v60 = vld [vmem:[%s4664_s12 + $0x38] sm:$0xff]  }
 0x808   :  { %v3694_v0 = vpop.permute.xlu1 %3693 }
 0x809   :  { %v3696_v23 = vunpack.i.h.bf16 %v3694_v0  ;;  %v3695_v24 = vunpack.i.l.bf16 %v3694_v0  ;;  %v3125_v0 = vld [vmem:[%s4663_s11] ss:$0 sm:$0xff] }
 0x80b   :  { %v1361_v4 = vsel %vm1359_vm10, %v1358_v6, %v3696_v23  ;;  %v1360_v7 = vsel %vm1359_vm10, %v1357_v59, %v3695_v24 }
 0x80c   :  { %v3210_v8 = vpack.c.bf16 %v1361_v4, %v1360_v7 }
 0x80e   :  { %3463 = vmatmul.mubr.msk.bf16.vlgmr.msra.gmra.mrb[40].mxu0 %vm259_vm6, %v3210_v8 }
 0x80f   :  { %3490 = vmatprep.mubr.msk.bf16.mxu0 %vm3875_vm7, %v3874_v17  ;;  %3475 = vmatpush3.bf16.msra.mxu0 %v3733_v40 }
 0x810   :  { %3476 = vmatprep.subr.bf16.mxu0 %v3874_v17 }
 0x813   :  { %3477 = vmatpush3.bf16.msra.mxu0 %v3734_v28 }
 0x814   :  { %3478 = vmatprep.subr.bf16.mxu0 %v3874_v17 }
 0x817   :  { %3479 = vmatpush3.bf16.msra.mxu0 %v3735_v61 }
 0x818   :  { %3480 = vmatprep.subr.bf16.mxu0 %v3874_v17 }
 0x81b   :  { %3481 = vmatpush3.bf16.msra.mxu0 %v3736_v62 }
 0x81c   :  { %3482 = vmatprep.subr.bf16.mxu0 %v3874_v17 }
 0x81f   :  { %3483 = vmatpush3.bf16.msra.mxu0 %v3737_v63 }
 0x820   :  { %3484 = vmatprep.subr.bf16.mxu0 %v3874_v17 }
 0x823   :  { %3485 = vmatpush3.bf16.msra.mxu0 %v3738_v34 }
 0x824   :  { %3486 = vmatprep.subr.bf16.mxu0 %v3874_v17 }
 0x827   :  { %3487 = vmatpush3.bf16.msra.mxu0 %v3739_v53 }
 0x828   :  { %3488 = vmatprep.subr.bf16.mxu0 %v3874_v17 }
 0x82b   :  { %3489 = vmatpush3.bf16.msra.mxu0 %v3740_v60 }
 0x82c   :  { %3520 = vmatprep.subr.bf16.mxu0 %v3874_v17 }
 0x8e1   :  { %v1422_v13 = vpop.f32.mrb[40].mxu0 }
 0x8e2   :  { %v1423_v29 = vadd.f32 %v1422_v13, %v1367_v12  ;;  %v3464_v14 = vpop.f32.mrb[41].mxu0 }
 0x8e3   :  { %v1425_v15 = vpop.f32.mrb[42].mxu0 }
 0x8e4   :  { %v1426_v16 = vadd.f32 %v1425_v15, %v1367_v12  ;;  %v3465_v18 = vpop.f32.mrb[43].mxu0  ;;  %v1429_v19 = vadd.f32 %v1423_v29, %v4034_v2 }
 0x8e6   :  { %v1431_v20 = vsel %vm259_vm6, %v1429_v19, 0.0  ;;  %v1430_v21 = vadd.f32 %v1426_v16, %v4036_v3  ;;  %v3731_v3 = vld [vmem:[%s4662_s10] sm:$0xff]  }
 0x8e7   :  { %1432 = vadd.xlane.f32.xlu0 %v1431_v20  ;;  %3467 = vmatpush3.bf16.msra.mxu1 %v3731_v3  ;;  %v1553_v20 = vsub.s32 3, %v4250_v9 }
 0x8e8   :  { %v1434_v22 = vsel %vm259_vm6, %v1430_v21, 0.0  ;;  %3468 = vmatprep.subr.bf16.mxu1 %v3874_v17 }
 0x8e9   :  { %1435 = vadd.xlane.f32.xlu1 %v1434_v22 }
 0x8eb   :  { %3469 = vmatpush3.bf16.msra.mxu1 %v3732_v38 }
 0x8ec   :  { %3494 = vmatprep.subr.bf16.mxu1 %v3874_v17 }
 0x974   :  { %v1433_v25 = vpop.xlane.xlu0 %1432 }
 0x975   :  { %v1437_v26 = vmul.f32 0.03125, %v1433_v25 }
 0x976   :  { %v1436_v27 = vpop.xlane.xlu1 %1435 }
 0x977   :  { %v1439_v30 = vsub.f32 %v1429_v19, %v1437_v26  ;;  %v1438_v31 = vmul.f32 0.03125, %v1436_v27 }
 0x979   :  { %v1440_v32 = vsub.f32 %v1430_v21, %v1438_v31  ;;  %v1441_v33 = vmul.f32 %v1439_v30, %v1439_v30  ;;  %v1554_v21 = vrot.slane %v4256_v11, %v1553_v20 }
 0x97b   :  { %v1443_v36 = vsel %vm259_vm6, %v1441_v33, 0.0  ;;  %v1442_v37 = vmul.f32 %v1440_v32, %v1440_v32 }
 0x97c   :  { %1444 = vadd.xlane.f32.xlu0 %v1443_v36 }
 0x97d   :  { %v1446_v2 = vsel %vm259_vm6, %v1442_v37, 0.0 }
 0x980   :  { %1447 = vadd.xlane.f32.xlu0 %v1446_v2 }
 0xa09   :  { %v1445_v39 = vpop.xlane.xlu0 %1444 }
 0xa0a   :  { %v1449_v35 = vmul.f32 0.03125, %v1445_v39 }
 0xa0c   :  { %v1451_v41 = vadd.f32 1e-12, %v1449_v35 }
 0xa0d   :  { %v1448_v42 = vpop.xlane.xlu0 %1447 }
 0xa0e   :  { %3791 = vrsqrt.f32 %v1451_v41  ;;  %v1450_v43 = vmul.f32 0.03125, %v1448_v42 }
 0xa10   :  { %v1452_v44 = vadd.f32 1e-12, %v1450_v43 }
 0xa12   :  { %3793 = vrsqrt.f32 %v1452_v44  ;;  %v3741_v44 = vld [vmem:[%s4659_s7 + $0x10] sm:$0xff]  }
 0xa18   :  { %v3792_v46 = vpop.eup %3791 }
 0xa19   :  { %v1455_v48 = vmul.f32 %v3792_v46, %v1439_v30  ;;  %v3742_v46 = vld [vmem:[%s4659_s7 + $0x18] sm:$0xff]  }
 0xa1b   :  { %v1461_v51 = vmul.f32 %v1460_v47, %v1455_v48 }
 0xa1c   :  { %v3794_v50 = vpop.eup %3793 }
 0xa1d   :  { %v1456_v52 = vmul.f32 %v3794_v50, %v1440_v32  ;;  %v1467_v56 = vadd.f32 %v1466_v54, %v1461_v51 }
 0xa1f   :  { %v1462_v55 = vmul.f32 %v1460_v47, %v1456_v52 }
 0xa21   :  { %v1468_v57 = vadd.f32 %v1466_v54, %v1462_v55  ;;  %v1680_v55 = vsub.s32 4, %v4250_v9 }
 0xa23   :  { %v3211_v58 = vpack.c.bf16 %v1468_v57, %v1467_v56 }
 0xa25   :  { %3471 = vmatmul.mubr.msk.bf16.vlgmr.msra.gmra.mrb[36].mxu1 %vm259_vm6, %v3211_v58 }
 0xa26   :  { %3498 = vmatprep.mubr.msk.bf16.mxu1 %vm3875_vm7, %v3874_v17  ;;  %3495 = vmatpush3.bf16.msra.mxu1 %v3741_v44 }
 0xa27   :  { %3496 = vmatprep.subr.bf16.mxu1 %v3874_v17 }
 0xa2a   :  { %3497 = vmatpush3.bf16.msra.mxu1 %v3742_v46 }
 0xa2b   :  { %3502 = vmatprep.subr.bf16.mxu1 %v3874_v17 }
 0xaf8   :  { %v1531_v1 = vpop.f32.mrb[36].mxu1 }
 0xaf9   :  { %v1532_v5 = vadd.f32 %v3125_v0, %v1531_v1  ;;  %v3472_v23 = vpop.f32.mrb[37].mxu1 }
 0xafa   :  { %v1534_v24 = vpop.f32.mrb[38].mxu1  ;;  %v3170_v23 = vld [vmem:[%s4660_s8 + $0x1] ss:$0 sm:$0xff] }
 0xafb   :  { %v1541_v6 = vmul.f32 0.70710677, %v1532_v5  ;;  %v1535_v59 = vadd.f32 %v3125_v0, %v1534_v24  ;;  %v3473_v4 = vpop.f32.mrb[39].mxu1  ;;  %v1538_v29 = vmul.f32 0.5, %v1532_v5 }
 0xafd   :  { %3795 = verf.f32 %v1541_v6  ;;  %v1542_v7 = vmul.f32 0.70710677, %v1535_v59  ;;  %v1539_v14 = vmul.f32 0.5, %v1535_v59 }
 0xaff   :  { %3797 = verf.f32 %v1542_v7 }
 0xb07   :  { %v3796_v8 = vpop.eup %3795 }
 0xb08   :  { %v1545_v12 = vadd.f32 1.0, %v3796_v8 }
 0xb09   :  { %v3798_v13 = vpop.eup %3797 }
 0xb0a   :  { %v1546_v15 = vadd.f32 1.0, %v3798_v13  ;;  %v1547_v16 = vmul.f32 %v1545_v12, %v1538_v29 }
 0xb0c   :  { %v1548_v18 = vmul.f32 %v1546_v15, %v1539_v14 }
 0xb0e   :  { %v3212_v19 = vpack.c.bf16 %v1548_v18, %v1547_v16 }
 0xb10   :  { %3491 = vmatmul.mubr.bf16.vlgmr.msra.gmra.mrb[44].mxu0 %v3212_v19 }
 0xb11   :  { %3522 = vmatprep.mubr.msk.bf16.mxu0 %vm3875_vm7, %v3874_v17 }
 0xbe3   :  { %v1643_v22 = vpop.f32.mrb[44].mxu0 }
 0xbe4   :  { %v1644_v25 = vadd.f32 %v1643_v22, %v1554_v21  ;;  %v3492_v26 = vpop.f32.mrb[45].mxu0 }
 0xbe5   :  { %v1646_v27 = vpop.f32.mrb[46].mxu0 }
 0xbe6   :  { %v1647_v30 = vadd.f32 %v1646_v27, %v1554_v21  ;;  %v3493_v31 = vpop.f32.mrb[47].mxu0  ;;  %v1650_v32 = vadd.f32 %v1644_v25, %v1467_v56  ;;  %v1681_v56 = vrot.slane %v4256_v11, %v1680_v55 }
 0xbe8   :  { %v1652_v33 = vsel %vm259_vm6, %v1650_v32, 0.0  ;;  %v1651_v36 = vadd.f32 %v1647_v30, %v1468_v57  ;;  %v1686_v57 = vsub.s32 5, %v4250_v9 }
 0xbe9   :  { %1653 = vadd.xlane.f32.xlu1 %v1652_v33 }
 0xbea   :  { %v1655_v37 = vsel %vm259_vm6, %v1651_v36, 0.0  ;;  %v1687_v53 = vrot.slane %v4256_v11, %v1686_v57 }
 0xbeb   :  { %1656 = vadd.xlane.f32.xlu0 %v1655_v37 }
 0xc76   :  { %v1654_v2 = vpop.xlane.xlu1 %1653 }
 0xc77   :  { %v1658_v3 = vmul.f32 0.03125, %v1654_v2 }
 0xc78   :  { %v1657_v38 = vpop.xlane.xlu0 %1656 }
 0xc79   :  { %v1660_v40 = vsub.f32 %v1650_v32, %v1658_v3  ;;  %v1659_v28 = vmul.f32 0.03125, %v1657_v38 }
 0xc7b   :  { %v1661_v39 = vsub.f32 %v1651_v36, %v1659_v28  ;;  %v1662_v35 = vmul.f32 %v1660_v40, %v1660_v40 }
 0xc7d   :  { %v1664_v41 = vsel %vm259_vm6, %v1662_v35, 0.0  ;;  %v1663_v42 = vmul.f32 %v1661_v39, %v1661_v39 }
 0xc7e   :  { %1665 = vadd.xlane.f32.xlu1 %v1664_v41 }
 0xc7f   :  { %v1667_v43 = vsel %vm259_vm6, %v1663_v42, 0.0 }
 0xc80   :  { %1668 = vadd.xlane.f32.xlu0 %v1667_v43 }
 0xd0b   :  { %v1666_v47 = vpop.xlane.xlu1 %1665 }
 0xd0c   :  { %v1670_v48 = vmul.f32 0.03125, %v1666_v47 }
 0xd0d   :  { %v1669_v50 = vpop.xlane.xlu0 %1668 }
 0xd0e   :  { %v1672_v51 = vadd.f32 1e-12, %v1670_v48  ;;  %v1671_v52 = vmul.f32 0.03125, %v1669_v50 }
 0xd10   :  { %3799 = vrsqrt.f32 %v1672_v51  ;;  %v1673_v54 = vadd.f32 1e-12, %v1671_v52 }
 0xd12   :  { %3801 = vrsqrt.f32 %v1673_v54 }
 0xd1a   :  { %v3800_v58 = vpop.eup %3799 }
 0xd1b   :  { %v1676_v61 = vmul.f32 %v3800_v58, %v1660_v40 }
 0xd1c   :  { %v3802_v62 = vpop.eup %3801 }
 0xd1d   :  { %v1682_v63 = vmul.f32 %v1681_v56, %v1676_v61  ;;  %v1677_v34 = vmul.f32 %v3802_v62, %v1661_v39 }
 0xd1f   :  { %v1683_v60 = vmul.f32 %v1681_v56, %v1677_v34  ;;  %v4347_v0 = vadd.f32 %v1687_v53, %v1682_v63  ;;  %v3847_v34 = vld [vmem:[%s4654_s2] ss:$0 sm:$0xff] }
 0xd21   :  { %v4349_v1 = vadd.f32 %v1687_v53, %v1683_v60 }
 0xd23   :  { %v3213_v5 = vpack.c.bf16 %v4349_v1, %v4347_v0 }
 0xd25   :  { %3499 = vmatmul.mubr.msk.bf16.vlgmr.msra.gmra.mrb[40].mxu1 %vm259_vm6, %v3213_v5 }
 0xd26   :  { %3504 = vmatprep.mubr.msk.bf16.mxu1 %vm3875_vm7, %v3874_v17 }
 0xdf8   :  { %v1790_v24 = vpop.f32.mrb[40].mxu1 }
 0xdf9   :  { %v3500_v6 = vpop.f32.mrb[41].mxu1  ;;  %v1791_v59 = vadd.f32 %v3170_v23, %v1790_v24 }
 0xdfa   :  { %v1793_v11 = vpop.f32.mrb[42].mxu1 }
 0xdfb   :  { %v1794_v4 = vadd.f32 %v3170_v23, %v1793_v11  ;;  %v3501_v7 = vpop.f32.mrb[43].mxu1  ;;  %v1817_v13 = vpack.c.bf16 %v1791_v59, %v1791_v59 }
 0xdfd   :  { %v3702_v8 = vpack.i.bf16 %v1794_v4, %v1791_v59  ;;  %v1818_v12 = vpack.c.bf16 %v1794_v4, %v1794_v4  ;;  %v3848_v59 = vld [vmem:[%s4654_s2 + $0x1] ss:$0 sm:$0xff] }
 0xdff   :  { %3703 = vrot.lane.b32.xlu0 %v3702_v8, %s3876_s6  ;;  %3698 = vrot.lane.b32.xlu1 %v3702_v8, %s3877_s29 }
 0xe03   :  { %3708 = vrot.lane.b32.xlu1 %v3702_v8, %s3878_s30  ;;  %1875 = vrot.lane.b32.xlu0 %v1818_v12, %s3879_s15 }
 0xe07   :  { %1826 = vrot.lane.b32.xlu1 %v1817_v13, %s3879_s15 }
 0xe71   :  { %v3704_v29 = vpop.permute.xlu0 %3703  ;;  %v3699_v14 = vpop.permute.xlu1 %3698 }
 0xe72   :  { %v3701_v15 = vunpack.i.h.bf16 %v3699_v14  ;;  %v3700_v16 = vunpack.i.l.bf16 %v3699_v14  ;;  %v3706_v18 = vunpack.i.h.bf16 %v3704_v29  ;;  %v3705_v19 = vunpack.i.l.bf16 %v3704_v29 }
 0xe74   :  { %v4364_v21 = vpack.c.bf16 %v3701_v15, %v3701_v15  ;;  %v4366_v22 = vpack.c.bf16 %v3700_v16, %v3700_v16  ;;  %v4372_v26 = vpack.c.bf16 %v3706_v18, %v3706_v18  ;;  %v4374_v27 = vpack.c.bf16 %v3705_v19, %v3705_v19 }
 0xe75   :  { %v3709_v25 = vpop.permute.xlu1 %3708  ;;  %v1876_v2 = vpop.permute.xlu0 %1875 }
 0xe76   :  { %1924 = vrot.lane.b32.xlu1 %v4366_v22, %s3879_s15  ;;  %1973 = vrot.lane.b32.xlu0 %v4364_v21, %s3879_s15  ;;  %v3711_v30 = vunpack.i.h.bf16 %v3709_v25  ;;  %v3710_v31 = vunpack.i.l.bf16 %v3709_v25  ;;  %v1881_v3 = vsel %vm170_vm3, %v1876_v2, 0 }
 0xe78   :  { %v4381_v36 = vpack.c.bf16 %v3711_v30, %v3711_v30  ;;  %v4383_v37 = vpack.c.bf16 %v3710_v31, %v3710_v31 }
 0xe79   :  { %v1827_v32 = vpop.permute.xlu1 %1826 }
 0xe7a   :  { %v1832_v33 = vsel %vm170_vm3, %v1827_v32, 0  ;;  %2022 = vrot.lane.b32.xlu1 %v4374_v27, %s3879_s15  ;;  %2071 = vrot.lane.b32.xlu0 %v4372_v26, %s3879_s15 }
 0xe7b   :  { %3503 = vmatpush3.bf16.xpose.msra.mxu1 %v1832_v33 }
 0xe7c   :  { %3508 = vmatprep.subr.bf16.mxu1 %v3874_v17 }
 0xe7e   :  { %2120 = vrot.lane.b32.xlu1 %v4383_v37, %s3879_s15  ;;  %2169 = vrot.lane.b32.xlu0 %v4381_v36, %s3879_s15 }
 0xe82   :  { %3505 = vmatmul.mubr.msk.bf16.vlgmr.msra.gmra.mrb[44].mxu1 %vm170_vm3, %v1817_v13  ;;  %2377 = vrot.lane.b32.xlu1 %v1818_v12, %s3880_s16 }
 0xe83   :  { %2329 = vrot.lane.b32.xlu0 %v1817_v13, %s3880_s16  ;;  %3509 = vmatpush3.bf16.xpose.msra.mxu1 %v1881_v3 }
 0xe84   :  { %3510 = vmatprep.mubr.msk.bf16.mxu1 %vm3875_vm7, %v3874_v17  ;;  %3514 = vmatprep.subr.bf16.mxu1 %v3874_v17 }
 0xe8a   :  { %3511 = vmatmul.mubr.msk.bf16.vlgmr.msra.gmra.mrb[48].mxu1 %vm170_vm3, %v1818_v12 }
 0xe8b   :  { %3516 = vmatprep.mubr.msk.bf16.mxu1 %vm3875_vm7, %v3874_v17 }
 0xee8   :  { %v1925_v38 = vpop.permute.xlu1 %1924  ;;  %v1974_v40 = vpop.permute.xlu0 %1973 }
 0xee9   :  { %v1930_v28 = vsel %vm170_vm3, %v1925_v38, 0  ;;  %v1979_v39 = vsel %vm170_vm3, %v1974_v40, 0 }
 0xeea   :  { %3515 = vmatpush3.bf16.xpose.msra.mxu1 %v1930_v28  ;;  %3521 = vmatpush3.bf16.xpose.msra.mxu0 %v1979_v39 }
 0xeeb   :  { %3526 = vmatprep.subr.bf16.mxu1 %v3874_v17  ;;  %3532 = vmatprep.subr.bf16.mxu0 %v3874_v17 }
 0xeec   :  { %v2023_v35 = vpop.permute.xlu1 %2022  ;;  %v2072_v41 = vpop.permute.xlu0 %2071 }
 0xeed   :  { %v2028_v42 = vsel %vm170_vm3, %v2023_v35, 0  ;;  %v2077_v43 = vsel %vm170_vm3, %v2072_v41, 0 }
 0xef0   :  { %v2121_v44 = vpop.permute.xlu1 %2120  ;;  %v2170_v46 = vpop.permute.xlu0 %2169 }
 0xef1   :  { %3517 = vmatmul.mubr.msk.bf16.vlgmr.msra.gmra.mrb[52].mxu1 %vm170_vm3, %v4366_v22  ;;  %3523 = vmatmul.mubr.msk.bf16.vlgmr.msra.gmra.mrb[48].mxu0 %vm170_vm3, %v4364_v21  ;;  %v2126_v47 = vsel %vm170_vm3, %v2121_v44, 0  ;;  %v2175_v48 = vsel %vm170_vm3, %v2170_v46, 0 }
 0xef2   :  { %3527 = vmatpush3.bf16.xpose.msra.mxu1 %v2028_v42  ;;  %3533 = vmatpush3.bf16.xpose.msra.mxu0 %v2077_v43 }
 0xef3   :  { %3528 = vmatprep.mubr.msk.bf16.mxu1 %vm3875_vm7, %v3874_v17  ;;  %3534 = vmatprep.mubr.msk.bf16.mxu0 %vm3875_vm7, %v3874_v17 }
 0xef4   :  { %3538 = vmatprep.subr.bf16.mxu1 %v3874_v17  ;;  %3544 = vmatprep.subr.bf16.mxu0 %v3874_v17  ;;  %v2378_v50 = vpop.permute.xlu1 %2377 }
 0xef5   :  { %v2330_v51 = vpop.permute.xlu0 %2329  ;;  %v2383_v52 = vsel %vm950_vm8, %v2378_v50, 0 }
 0xef6   :  { %v2335_v54 = vsel %vm950_vm8, %v2330_v51, 0 }
 0xef9   :  { %3529 = vmatmul.mubr.msk.bf16.vlgmr.msra.gmra.mrb[56].mxu1 %vm170_vm3, %v4374_v27  ;;  %3535 = vmatmul.mubr.msk.bf16.vlgmr.msra.gmra.mrb[52].mxu0 %vm170_vm3, %v4372_v26 }
 0xefa   :  { %3539 = vmatpush3.bf16.xpose.msra.mxu1 %v2126_v47  ;;  %3545 = vmatpush3.bf16.xpose.msra.mxu0 %v2175_v48 }
 0xefb   :  { %3540 = vmatprep.mubr.msk.bf16.mxu1 %vm3875_vm7, %v3874_v17  ;;  %3546 = vmatprep.mubr.msk.bf16.mxu0 %vm3875_vm7, %v3874_v17 }
 0xefc   :  { %3550 = vmatprep.subr.bf16.mxu1 %v3874_v17  ;;  %3556 = vmatprep.subr.bf16.mxu0 %v3874_v17 }
 0xf01   :  { %3541 = vmatmul.mubr.msk.bf16.vlgmr.msra.gmra.mrb[60].mxu1 %vm170_vm3, %v4383_v37  ;;  %3547 = vmatmul.mubr.msk.bf16.vlgmr.msra.gmra.mrb[56].mxu0 %vm170_vm3, %v4381_v36 }
 0xf02   :  { %3551 = vmatpush3.bf16.msra.mxu1 %v2335_v54  ;;  %3557 = vmatpush3.bf16.msra.mxu0 %v2383_v52 }
 0xf03   :  { %3552 = vmatprep.mubr.msk.bf16.mxu1 %vm3875_vm7, %v3874_v17  ;;  %3558 = vmatprep.mubr.msk.bf16.mxu0 %vm3875_vm7, %v3874_v17 }
 0xf04   :  { %3562 = vmatprep.subr.bf16.mxu1 %v3874_v17  ;;  %3568 = vmatprep.subr.bf16.mxu0 %v3874_v17 }
 0xf55   :  { %v1868_v56 = vpop.f32.mrb[44].mxu1 }
 0xf56   :  { %v2217_v58 = vmul.f32 0.35355338, %v1868_v56  ;;  %v3506_v61 = vpop.f32.mrb[45].mxu1 }
 0xf57   :  { %v1871_v62 = vpop.f32.mrb[46].mxu1 }
 0xf58   :  { %v3507_v63 = vpop.f32.mrb[47].mxu1  ;;  %v4443_v53 = vadd.f32 %v3847_v34, %v2217_v58 }
 0xf5a   :  { %v2233_v60 = vsel %vm170_vm3, %v4443_v53, -inf }
 0xf5b   :  { %2234 = vmax.xlane.f32.xlu1 %v2233_v60 }
 0xf5d   :  { %v1917_v5 = vpop.f32.mrb[48].mxu1 }
 0xf5e   :  { %v2218_v23 = vmul.f32 0.35355338, %v1917_v5  ;;  %v3512_v24 = vpop.f32.mrb[49].mxu1 }
 0xf5f   :  { %v1920_v6 = vpop.f32.mrb[50].mxu1 }
 0xf60   :  { %v3513_v11 = vpop.f32.mrb[51].mxu1  ;;  %v2226_v4 = vadd.f32 %v3848_v59, %v2218_v23 }
 0xf62   :  { %v2236_v7 = vsel %vm170_vm3, %v2226_v4, -inf }
 0xf63   :  { %2237 = vmax.xlane.f32.xlu0 %v2236_v7 }
 0xfc4   :  { %v1966_v8 = vpop.f32.mrb[52].mxu1  ;;  %v2015_v12 = vpop.f32.mrb[48].mxu0 }
 0xfc5   :  { %v2219_v13 = vmul.f32 0.35355338, %v1966_v8  ;;  %v2220_v29 = vmul.f32 0.35355338, %v2015_v12  ;;  %v3518_v14 = vpop.f32.mrb[53].mxu1  ;;  %v3524_v15 = vpop.f32.mrb[49].mxu0 }
 0xfc6   :  { %v1969_v16 = vpop.f32.mrb[54].mxu1  ;;  %v2018_v18 = vpop.f32.mrb[50].mxu0 }
 0xfc7   :  { %v3519_v19 = vpop.f32.mrb[55].mxu1  ;;  %v3525_v25 = vpop.f32.mrb[51].mxu0  ;;  %v2227_v30 = vadd.f32 %v3847_v34, %v2219_v13  ;;  %v2228_v31 = vadd.f32 %v3848_v59, %v2220_v29 }
 0xfc9   :  { %v2239_v32 = vsel %vm170_vm3, %v2227_v30, -inf  ;;  %v2242_v33 = vsel %vm170_vm3, %v2228_v31, -inf }
 0xfca   :  { %2240 = vmax.xlane.f32.xlu0 %v2239_v32  ;;  %2243 = vmax.xlane.f32.xlu1 %v2242_v33 }
 0xfcc   :  { %v2064_v2 = vpop.f32.mrb[56].mxu1  ;;  %v2113_v3 = vpop.f32.mrb[52].mxu0 }
 0xfcd   :  { %v2221_v38 = vmul.f32 0.35355338, %v2064_v2  ;;  %v2222_v40 = vmul.f32 0.35355338, %v2113_v3  ;;  %v3530_v28 = vpop.f32.mrb[57].mxu1  ;;  %v3536_v39 = vpop.f32.mrb[53].mxu0 }
 0xfce   :  { %v2067_v35 = vpop.f32.mrb[58].mxu1  ;;  %v2116_v41 = vpop.f32.mrb[54].mxu0 }
 0xfcf   :  { %v3531_v42 = vpop.f32.mrb[59].mxu1  ;;  %v3537_v43 = vpop.f32.mrb[55].mxu0  ;;  %v4453_v44 = vadd.f32 %v3847_v34, %v2221_v38  ;;  %v2230_v46 = vadd.f32 %v3848_v59, %v2222_v40 }
 0xfd1   :  { %v2245_v47 = vsel %vm170_vm3, %v4453_v44, -inf  ;;  %v2248_v48 = vsel %vm170_vm3, %v2230_v46, -inf }
 0xfd2   :  { %2246 = vmax.xlane.f32.xlu0 %v2245_v47  ;;  %2249 = vmax.xlane.f32.xlu1 %v2248_v48 }
 0xfd4   :  { %v2162_v50 = vpop.f32.mrb[60].mxu1  ;;  %v2211_v51 = vpop.f32.mrb[56].mxu0 }
 0xfd5   :  { %v2223_v52 = vmul.f32 0.35355338, %v2162_v50  ;;  %v2224_v54 = vmul.f32 0.35355338, %v2211_v51  ;;  %v3542_v56 = vpop.f32.mrb[61].mxu1  ;;  %v3548_v58 = vpop.f32.mrb[57].mxu0 }
 0xfd6   :  { %v2165_v61 = vpop.f32.mrb[62].mxu1  ;;  %v2214_v62 = vpop.f32.mrb[58].mxu0 }
 0xfd7   :  { %v3543_v63 = vpop.f32.mrb[63].mxu1  ;;  %v3549_v60 = vpop.f32.mrb[59].mxu0  ;;  %v2231_v5 = vadd.f32 %v3847_v34, %v2223_v52  ;;  %v2232_v23 = vadd.f32 %v3848_v59, %v2224_v54 }
 0xfd9   :  { %v2251_v24 = vsel %vm170_vm3, %v2231_v5, -inf  ;;  %v2254_v6 = vsel %vm170_vm3, %v2232_v23, -inf }
 0xfda   :  { %2252 = vmax.xlane.f32.xlu0 %v2251_v24  ;;  %2255 = vmax.xlane.f32.xlu1 %v2254_v6 }
 0xfe8   :  { %v2235_v11 = vpop.xlane.xlu1 %2234 }
 0xfe9   :  { %v2257_v8 = vsub.f32 %v4443_v53, %v2235_v11 }
 0xfeb   :  { %2425 = vrot.lane.b32.xlu1 %v4366_v22, %s3880_s16  ;;  %v2265_v13 = vmul.f32 1.442695, %v2257_v8 }
 0xfed   :  { %3803 = vpow2.f32 %v2265_v13 }
 0xff0   :  { %2473 = vrot.lane.b32.xlu0 %v4364_v21, %s3880_s16  ;;  %v2238_v7 = vpop.xlane.xlu0 %2237 }
 0xff1   :  { %v2258_v12 = vsub.f32 %v2226_v4, %v2238_v7 }
 0xff3   :  { %v2267_v34 = vmul.f32 1.442695, %v2258_v12 }
 0xff5   :  { %3805 = vpow2.f32 %v2267_v34 }
 0xff7   :  { %v3804_v59 = vpop.eup %3803 }
 0xff8   :  { %v2281_v14 = vsel %vm170_vm3, %v3804_v59, 0.0 }
 0xfff   :  { %v3806_v29 = vpop.eup %3805 }
0x1000   :  { %v2284_v15 = vsel %vm170_vm3, %v3806_v29, 0.0 }
0x100f   :  { %2282 = vadd.xlane.f32.xlu0 %v2281_v14  ;;  %2285 = vadd.xlane.f32.xlu1 %v2284_v15 }
0x1020   :  { %2521 = vrot.lane.b32.xlu1 %v4374_v27, %s3880_s16 }
0x1057   :  { %v2241_v21 = vpop.xlane.xlu0 %2240  ;;  %v2244_v22 = vpop.xlane.xlu1 %2243 }
0x1058   :  { %v2259_v16 = vsub.f32 %v2227_v30, %v2241_v21  ;;  %v2260_v53 = vsub.f32 %v2228_v31, %v2244_v22 }
0x105a   :  { %v2269_v4 = vmul.f32 1.442695, %v2259_v16  ;;  %v2271_v18 = vmul.f32 1.442695, %v2260_v53 }
0x105c   :  { %3807 = vpow2.f32 %v2269_v4 }
0x105d   :  { %3809 = vpow2.f32 %v2271_v18 }
0x105f   :  { %v2250_v19 = vpop.xlane.xlu1 %2249  ;;  %v2247_v41 = vpop.xlane.xlu0 %2246 }
0x1060   :  { %v2262_v25 = vsub.f32 %v2230_v46, %v2250_v19  ;;  %v2261_v42 = vsub.f32 %v4453_v44, %v2247_v41 }
0x1062   :  { %v2275_v32 = vmul.f32 1.442695, %v2262_v25  ;;  %v2273_v46 = vmul.f32 1.442695, %v2261_v42 }
0x1064   :  { %3811 = vpow2.f32 %v2275_v32 }
0x1066   :  { %v4469_v33 = vpop.eup %3807 }
0x1067   :  { %v4471_v2 = vpop.eup %3809  ;;  %v2256_v3 = vpop.xlane.xlu1 %2255  ;;  %v2287_v27 = vsel %vm170_vm3, %v4469_v33, 0.0 }
0x1068   :  { %v2264_v38 = vsub.f32 %v2232_v23, %v2256_v3  ;;  %2288 = vadd.xlane.f32.xlu0 %v2287_v27  ;;  %v2290_v30 = vsel %vm170_vm3, %v4471_v2, 0.0  ;;  %v2253_v43 = vpop.xlane.xlu0 %2252 }
0x1069   :  { %2291 = vadd.xlane.f32.xlu1 %v2290_v30  ;;  %v2263_v47 = vsub.f32 %v2231_v5, %v2253_v43 }
0x106a   :  { %v2279_v31 = vmul.f32 1.442695, %v2264_v38 }
0x106b   :  { %v2277_v48 = vmul.f32 1.442695, %v2263_v47  ;;  %v2426_v51 = vpop.permute.xlu1 %2425 }
0x106c   :  { %3813 = vpow2.f32 %v2279_v31  ;;  %v2474_v50 = vpop.permute.xlu0 %2473  ;;  %v2431_v23 = vsel %vm950_vm8, %v2426_v51, 0 }
0x106d   :  { %3815 = vpow2.f32 %v2273_v46  ;;  %v2479_v24 = vsel %vm950_vm8, %v2474_v50, 0 }
0x106e   :  { %v4477_v40 = vpop.eup %3811  ;;  %3817 = vpow2.f32 %v2277_v48 }
0x106f   :  { %v2296_v28 = vsel %vm170_vm3, %v4477_v40, 0.0 }
0x1070   :  { %2297 = vadd.xlane.f32.xlu1 %v2296_v28 }
0x1076   :  { %v4481_v39 = vpop.eup %3813 }
0x1077   :  { %v2302_v35 = vsel %vm170_vm3, %v4481_v39, 0.0  ;;  %v4490_v52 = vpop.eup %3815 }
0x1078   :  { %2303 = vadd.xlane.f32.xlu1 %v2302_v35  ;;  %v4494_v58 = vpop.eup %3817 }
0x107e   :  { %2569 = vrot.lane.b32.xlu0 %v4372_v26, %s3880_s16  ;;  %v2293_v26 = vsel %vm170_vm3, %v4490_v52, 0.0 }
0x1089   :  { %2617 = vrot.lane.b32.xlu1 %v4383_v37, %s3880_s16  ;;  %v2299_v37 = vsel %vm170_vm3, %v4494_v58, 0.0 }
0x109c   :  { %v2283_v54 = vpop.xlane.xlu0 %2282  ;;  %v2286_v56 = vpop.xlane.xlu1 %2285 }
0x109d   :  { %3819 = vrcp.f32 %v2283_v54  ;;  %2294 = vadd.xlane.f32.xlu0 %v2293_v26 }
0x109e   :  { %3821 = vrcp.f32 %v2286_v56 }
0x10a0   :  { %v2522_v6 = vpop.permute.xlu1 %2521 }
0x10a1   :  { %2300 = vadd.xlane.f32.xlu0 %v2299_v37  ;;  %v2527_v21 = vsel %vm950_vm8, %v2522_v6, 0 }
0x10a7   :  { %v3820_v44 = vpop.eup %3819 }
0x10a8   :  { %v3822_v61 = vpop.eup %3821  ;;  %v2313_v62 = vmul.f32 %v3820_v44, %v3804_v59 }
0x10a9   :  { %v2314_v63 = vmul.f32 %v3822_v61, %v3806_v29 }
0x10aa   :  { %v2321_v60 = vpack.c.bf16 %v2313_v62, %v2313_v62 }
0x10ab   :  { %v2322_v5 = vpack.c.bf16 %v2314_v63, %v2314_v63 }
0x10ac   :  { %3553 = vmatmul.mubr.msk.bf16.vlgmr.msra.gmra.mrb[64].mxu1 %vm170_vm3, %v2321_v60 }
0x10ad   :  { %3559 = vmatmul.mubr.msk.bf16.vlgmr.msra.gmra.mrb[60].mxu0 %vm170_vm3, %v2322_v5  ;;  %3563 = vmatpush3.bf16.msra.mxu1 %v2431_v23 }
0x10ae   :  { %3569 = vmatpush3.bf16.msra.mxu0 %v2479_v24  ;;  %3564 = vmatprep.mubr.msk.bf16.mxu1 %vm3875_vm7, %v3874_v17  ;;  %v3743_v24 = vld [vmem:[%s4661_s9 + $0x10] sm:$0xff]  }
0x10af   :  { %3570 = vmatprep.mubr.msk.bf16.mxu0 %vm3875_vm7, %v3874_v17  ;;  %3574 = vmatprep.subr.bf16.mxu1 %v3874_v17 }
0x10b0   :  { %3580 = vmatprep.subr.bf16.mxu0 %v3874_v17 }
0x10b7   :  { %2665 = vrot.lane.b32.xlu0 %v4381_v36, %s3880_s16 }
0x10f5   :  { %v2289_v11 = vpop.xlane.xlu0 %2288 }
0x10f6   :  { %3823 = vrcp.f32 %v2289_v11  ;;  %v2292_v7 = vpop.xlane.xlu1 %2291 }
0x10f7   :  { %3825 = vrcp.f32 %v2292_v7 }
0x10f9   :  { %v2570_v29 = vpop.permute.xlu0 %2569 }
0x10fa   :  { %v2575_v36 = vsel %vm950_vm8, %v2570_v29, 0 }
0x10fd   :  { %v2298_v8 = vpop.xlane.xlu1 %2297 }
0x10fe   :  { %3827 = vrcp.f32 %v2298_v8 }
0x1100   :  { %v3824_v12 = vpop.eup %3823 }
0x1101   :  { %v3826_v13 = vpop.eup %3825  ;;  %v2315_v34 = vmul.f32 %v3824_v12, %v4469_v33 }
0x1102   :  { %v2316_v59 = vmul.f32 %v3826_v13, %v4471_v2  ;;  %v3744_v13 = vld [vmem:[%s4661_s9 + $0x18] sm:$0xff]  }
0x1103   :  { %v2323_v14 = vpack.c.bf16 %v2315_v34, %v2315_v34 }
0x1104   :  { %v2324_v15 = vpack.c.bf16 %v2316_v59, %v2316_v59 }
0x1105   :  { %3565 = vmatmul.mubr.msk.bf16.vlgmr.msra.gmra.mrb[68].mxu1 %vm170_vm3, %v2323_v14  ;;  %v2304_v4 = vpop.xlane.xlu1 %2303 }
0x1106   :  { %3571 = vmatmul.mubr.msk.bf16.vlgmr.msra.gmra.mrb[64].mxu0 %vm170_vm3, %v2324_v15  ;;  %3575 = vmatpush3.bf16.msra.mxu1 %v2527_v21  ;;  %3829 = vrcp.f32 %v2304_v4 }
0x1107   :  { %3581 = vmatpush3.bf16.msra.mxu0 %v2575_v36  ;;  %3582 = vmatprep.mubr.msk.bf16.mxu0 %vm3875_vm7, %v3874_v17 }
0x1108   :  { %3592 = vmatprep.subr.bf16.mxu0 %v3874_v17  ;;  %3576 = vmatprep.mubr.msk.bf16.mxu1 %vm3875_vm7, %v3874_v17  ;;  %v3828_v22 = vpop.eup %3827 }
0x1109   :  { %3586 = vmatprep.subr.bf16.mxu1 %v3874_v17  ;;  %v2318_v16 = vmul.f32 %v3828_v22, %v4477_v40  ;;  %v2618_v30 = vpop.permute.xlu1 %2617 }
0x110a   :  { %v2623_v28 = vsel %vm950_vm8, %v2618_v30, 0 }
0x110b   :  { %v2326_v53 = vpack.c.bf16 %v2318_v16, %v2318_v16 }
0x110e   :  { %3583 = vmatmul.mubr.msk.bf16.vlgmr.msra.gmra.mrb[68].mxu0 %vm170_vm3, %v2326_v53 }
0x110f   :  { %3594 = vmatprep.mubr.msk.bf16.mxu0 %vm3875_vm7, %v3874_v17 }
0x1110   :  { %v3830_v19 = vpop.eup %3829 }
0x1111   :  { %v2320_v32 = vmul.f32 %v3830_v19, %v4481_v39 }
0x1113   :  { %v2328_v27 = vpack.c.bf16 %v2320_v32, %v2320_v32 }
0x112a   :  { %v2295_v18 = vpop.xlane.xlu0 %2294 }
0x112b   :  { %3831 = vrcp.f32 %v2295_v18 }
0x112e   :  { %v2301_v25 = vpop.xlane.xlu0 %2300 }
0x112f   :  { %3833 = vrcp.f32 %v2301_v25 }
0x1132   :  { %v2666_v33 = vpop.permute.xlu0 %2665 }
0x1133   :  { %v2671_v2 = vsel %vm950_vm8, %v2666_v33, 0 }
0x1134   :  { %3593 = vmatpush3.bf16.msra.mxu0 %v2671_v2 }
0x1135   :  { %v3832_v3 = vpop.eup %3831  ;;  %3606 = vmatprep.subr.bf16.mxu0 %v3874_v17 }
0x1136   :  { %v2317_v38 = vmul.f32 %v3832_v3, %v4490_v52 }
0x1137   :  { %3595 = vmatmul.mubr.msk.bf16.vlgmr.msra.gmra.mrb[72].mxu0 %vm170_vm3, %v2328_v27 }
0x1138   :  { %v2325_v31 = vpack.c.bf16 %v2317_v38, %v2317_v38  ;;  %3610 = vmatprep.mubr.msk.bf16.mxu0 %vm3875_vm7, %v3874_v17 }
0x1139   :  { %v3834_v40 = vpop.eup %3833 }
0x113a   :  { %3577 = vmatmul.mubr.msk.bf16.vlgmr.msra.gmra.mrb[72].mxu1 %vm170_vm3, %v2325_v31  ;;  %v2319_v39 = vmul.f32 %v3834_v40, %v4494_v58 }
0x113b   :  { %3587 = vmatpush3.bf16.msra.mxu1 %v2623_v28  ;;  %3588 = vmatprep.mubr.msk.bf16.mxu1 %vm3875_vm7, %v3874_v17 }
0x113c   :  { %3598 = vmatprep.subr.bf16.mxu1 %v3874_v17  ;;  %v2327_v35 = vpack.c.bf16 %v2319_v39, %v2319_v39 }
0x1142   :  { %3589 = vmatmul.mubr.msk.bf16.vlgmr.msra.gmra.mrb[76].mxu1 %vm170_vm3, %v2327_v35  ;;  %v4565_v35 = vld [vmem:[%s4665_s13 + $0x8] sm:$0xff] }
0x1143   :  { %3602 = vmatprep.mubr.msk.bf16.mxu1 %vm3875_vm7, %v3874_v17  ;;  %3599 = vmatpush3.bf16.msra.mxu1 %v3743_v24  ;;  %v3748_v24 = vld [vmem:[%s4664_s12 + $0x48] sm:$0xff]  }
0x1144   :  { %3600 = vmatprep.subr.bf16.mxu1 %v3874_v17 }
0x1147   :  { %3601 = vmatpush3.bf16.msra.mxu1 %v3744_v13 }
0x1148   :  { %3614 = vmatprep.subr.bf16.mxu1 %v3874_v17 }
0x117f   :  { %v2371_v41 = vpop.f32.mrb[64].mxu1 }
0x1180   :  { %v2419_v42 = vpop.f32.mrb[60].mxu0  ;;  %v3554_v43 = vpop.f32.mrb[65].mxu1 }
0x1181   :  { %v3560_v46 = vpop.f32.mrb[61].mxu0  ;;  %v2374_v47 = vpop.f32.mrb[66].mxu1 }
0x1182   :  { %v2422_v48 = vpop.f32.mrb[62].mxu0  ;;  %v3555_v50 = vpop.f32.mrb[67].mxu1 }
0x1183   :  { %v3561_v51 = vpop.f32.mrb[63].mxu0 }
0x11d8   :  { %v2467_v52 = vpop.f32.mrb[68].mxu1 }
0x11d9   :  { %v2515_v54 = vpop.f32.mrb[64].mxu0  ;;  %v3566_v56 = vpop.f32.mrb[69].mxu1 }
0x11da   :  { %v3712_v26 = vpack.i.bf16 %v2515_v54, %v2467_v52  ;;  %v3572_v58 = vpop.f32.mrb[65].mxu0  ;;  %v2470_v37 = vpop.f32.mrb[70].mxu1 }
0x11db   :  { %v2518_v44 = vpop.f32.mrb[66].mxu0  ;;  %v3567_v61 = vpop.f32.mrb[71].mxu1 }
0x11dc   :  { %3713 = vrot.lane.b32.xlu1 %v3712_v26, %s3881_s20  ;;  %v3573_v62 = vpop.f32.mrb[67].mxu0 }
0x11e1   :  { %v2611_v63 = vpop.f32.mrb[68].mxu0 }
0x11e2   :  { %v3584_v60 = vpop.f32.mrb[69].mxu0 }
0x11e3   :  { %v2614_v5 = vpop.f32.mrb[70].mxu0 }
0x11e4   :  { %v3585_v23 = vpop.f32.mrb[71].mxu0  ;;  %v3746_v5 = vld [vmem:[%s4662_s10 + $0x18] sm:$0xff]  }
0x11e5   :  { %v3747_v23 = vld [vmem:[%s4664_s12 + $0x40] sm:$0xff]  }
0x120a   :  { %v2707_v6 = vpop.f32.mrb[72].mxu0 }
0x120b   :  { %v3596_v11 = vpop.f32.mrb[73].mxu0 }
0x120c   :  { %v2710_v7 = vpop.f32.mrb[74].mxu0 }
0x120d   :  { %v2563_v8 = vpop.f32.mrb[72].mxu1  ;;  %v3597_v12 = vpop.f32.mrb[75].mxu0 }
0x120e   :  { %v3717_v34 = vpack.i.bf16 %v2611_v63, %v2563_v8  ;;  %v3578_v59 = vpop.f32.mrb[73].mxu1 }
0x120f   :  { %v2566_v29 = vpop.f32.mrb[74].mxu1  ;;  %v2841_v59 = vrot.slane %v4565_v35, %v1459_v45  ;;  %v3750_v45 = vld [vmem:[%s4664_s12 + $0x58] sm:$0xff]  }
0x1210   :  { %v3579_v14 = vpop.f32.mrb[75].mxu1  ;;  %3718 = vrot.lane.b32.xlu0 %v3717_v34, %s3882_s22 }
0x1215   :  { %v2659_v15 = vpop.f32.mrb[76].mxu1 }
0x1216   :  { %v3722_v21 = vpack.i.bf16 %v2707_v6, %v2659_v15  ;;  %v3590_v36 = vpop.f32.mrb[77].mxu1 }
0x1217   :  { %v2662_v22 = vpop.f32.mrb[78].mxu1  ;;  %v2847_v36 = vrot.slane %v4565_v35, %v1465_v49  ;;  %v3751_v49 = vld [vmem:[%s4664_s12 + $0x60] sm:$0xff]  }
0x1218   :  { %v3591_v16 = vpop.f32.mrb[79].mxu1  ;;  %3723 = vrot.lane.b32.xlu1 %v3722_v21, %s3883_s23 }
0x124e   :  { %v3714_v53 = vpop.permute.xlu1 %3713 }
0x124f   :  { %v3716_v18 = vunpack.i.h.bf16 %v3714_v53  ;;  %v3715_v19 = vunpack.i.l.bf16 %v3714_v53 }
0x1251   :  { %v2738_v2 = vsel %vm170_vm3, %v2419_v42, %v3716_v18  ;;  %v2737_v3 = vsel %vm170_vm3, %v2371_v41, %v3715_v19  ;;  %v2748_v41 = vrot.slane %v4565_v35, %v1366_v10  ;;  %v3749_v18 = vld [vmem:[%s4664_s12 + $0x50] sm:$0xff]   ;;  %v3752_v19 = vld [vmem:[%s4664_s12 + $0x68] sm:$0xff]  }
0x1282   :  { %v3719_v4 = vpop.permute.xlu0 %3718 }
0x1283   :  { %v3721_v25 = vunpack.i.h.bf16 %v3719_v4  ;;  %v3720_v32 = vunpack.i.l.bf16 %v3719_v4 }
0x1285   :  { %v2740_v30 = vsel %vm1356_vm9, %v2738_v2, %v3721_v25  ;;  %v2739_v31 = vsel %vm1356_vm9, %v2737_v3, %v3720_v32  ;;  %v3753_v25 = vld [vmem:[%s4664_s12 + $0x70] sm:$0xff]   ;;  %v3754_v32 = vld [vmem:[%s4664_s12 + $0x78] sm:$0xff]  }
0x128a   :  { %v3724_v33 = vpop.permute.xlu1 %3723 }
0x128b   :  { %v3726_v27 = vunpack.i.h.bf16 %v3724_v33  ;;  %v3725_v38 = vunpack.i.l.bf16 %v3724_v33  ;;  %v3195_v33 = vld [vmem:[%s4663_s11 + $0x1] ss:$0 sm:$0xff]  ;;  %s3884_s11 = smov [#allocation2]  }
0x128c   :  { %s3077_s12 = sshll.u32 %s3884_s11, 4  ;;  %s3078_s12 = int_to_ptr.vmem [resolvable:$true] %s3077_s12 }
0x128d   :  { %v2742_v40 = vsel %vm1359_vm10, %v2740_v30, %v3726_v27  ;;  %v2741_v28 = vsel %vm1359_vm10, %v2739_v31, %v3725_v38  ;;  %s3849_s15 = scalar_lea.vmem %s3078_s12, 256  ;;  %p3854_p1 = scmp.lt.s32.totalorder %s3078_s12, %s3078_s12 }
0x128e   :  { %v3214_v39 = vpack.c.bf16 %v2742_v40, %v2741_v28  ;;  %p3850_p0 = scmp.ne.s32.totalorder %s3078_s12, %s3849_s15  ;;  %p3855_p2 = scmp.lt.s32.totalorder %s3849_s15, %s3849_s15 }
0x1290   :  { %3603 = vmatmul.mubr.msk.bf16.vlgmr.msra.gmra.mrb[80].mxu1 %vm259_vm6, %v3214_v39  ;;  %p3856_p3 = por %p3855_p2, %p3854_p1 }
0x1291   :  { %3630 = vmatprep.mubr.msk.bf16.mxu1 %vm3875_vm7, %v3874_v17  ;;  %3615 = vmatpush3.bf16.msra.mxu1 %v3747_v23 }
0x1292   :  { %3616 = vmatprep.subr.bf16.mxu1 %v3874_v17  ;;  %p3857_p4 = pnand %p3856_p3, %p3850_p0 }
0x1295   :  { %3617 = vmatpush3.bf16.msra.mxu1 %v3748_v24 }
0x1296   :  { %3618 = vmatprep.subr.bf16.mxu1 %v3874_v17 }
0x1299   :  { %3619 = vmatpush3.bf16.msra.mxu1 %v3749_v18 }
0x129a   :  { %3620 = vmatprep.subr.bf16.mxu1 %v3874_v17 }
0x129d   :  { %3621 = vmatpush3.bf16.msra.mxu1 %v3750_v45 }
0x129e   :  { %3622 = vmatprep.subr.bf16.mxu1 %v3874_v17 }
0x12a1   :  { %3623 = vmatpush3.bf16.msra.mxu1 %v3751_v49 }
0x12a2   :  { %3624 = vmatprep.subr.bf16.mxu1 %v3874_v17 }
0x12a5   :  { %3625 = vmatpush3.bf16.msra.mxu1 %v3752_v19 }
0x12a6   :  { %3626 = vmatprep.subr.bf16.mxu1 %v3874_v17 }
0x12a9   :  { %3627 = vmatpush3.bf16.msra.mxu1 %v3753_v25 }
0x12aa   :  { %3628 = vmatprep.subr.bf16.mxu1 %v3874_v17 }
0x12ad   :  { %3629 = vmatpush3.bf16.msra.mxu1 %v3754_v32 }
0x1363   :  { %v2803_v42 = vpop.f32.mrb[80].mxu1 }
0x1364   :  { %v2804_v43 = vadd.f32 %v2803_v42, %v2748_v41  ;;  %v3604_v46 = vpop.f32.mrb[81].mxu1 }
0x1365   :  { %v2806_v47 = vpop.f32.mrb[82].mxu1 }
0x1366   :  { %v2807_v48 = vadd.f32 %v2806_v47, %v2748_v41  ;;  %v3605_v50 = vpop.f32.mrb[83].mxu1  ;;  %v2810_v51 = vadd.f32 %v2804_v43, %v4347_v0 }
0x1368   :  { %v2812_v52 = vsel %vm259_vm6, %v2810_v51, 0.0  ;;  %v2811_v54 = vadd.f32 %v2807_v48, %v4349_v1  ;;  %v3745_v1 = vld [vmem:[%s4662_s10 + $0x10] sm:$0xff]  }
0x1369   :  { %2813 = vadd.xlane.f32.xlu0 %v2812_v52  ;;  %3607 = vmatpush3.bf16.msra.mxu0 %v3745_v1 }
0x136a   :  { %v2815_v56 = vsel %vm259_vm6, %v2811_v54, 0.0  ;;  %3608 = vmatprep.subr.bf16.mxu0 %v3874_v17 }
0x136b   :  { %2816 = vadd.xlane.f32.xlu1 %v2815_v56 }
0x136d   :  { %3609 = vmatpush3.bf16.msra.mxu0 %v3746_v5 }
0x13f6   :  { %v2814_v26 = vpop.xlane.xlu0 %2813 }
0x13f7   :  { %v2818_v58 = vmul.f32 0.03125, %v2814_v26 }
0x13f8   :  { %v2817_v37 = vpop.xlane.xlu1 %2816 }
0x13f9   :  { %v2820_v10 = vsub.f32 %v2810_v51, %v2818_v58  ;;  %v2819_v44 = vmul.f32 0.03125, %v2817_v37  ;;  %v2934_v51 = vrot.slane %v4565_v35, %v1553_v20 }
0x13fb   :  { %v2821_v61 = vsub.f32 %v2811_v54, %v2819_v44  ;;  %v2822_v62 = vmul.f32 %v2820_v10, %v2820_v10 }
0x13fd   :  { %v2824_v63 = vsel %vm259_vm6, %v2822_v62, 0.0  ;;  %v2823_v60 = vmul.f32 %v2821_v61, %v2821_v61 }
0x13fe   :  { %2825 = vadd.xlane.f32.xlu0 %v2824_v63 }
0x13ff   :  { %v2827_v0 = vsel %vm259_vm6, %v2823_v60, 0.0 }
0x1402   :  { %2828 = vadd.xlane.f32.xlu0 %v2827_v0 }
0x148b   :  { %v2826_v6 = vpop.xlane.xlu0 %2825 }
0x148c   :  { %v2830_v11 = vmul.f32 0.03125, %v2826_v6 }
0x148e   :  { %v2832_v7 = vadd.f32 1e-12, %v2830_v11 }
0x148f   :  { %v2829_v8 = vpop.xlane.xlu0 %2828 }
0x1490   :  { %3835 = vrsqrt.f32 %v2832_v7  ;;  %v2831_v12 = vmul.f32 0.03125, %v2829_v8 }
0x1492   :  { %v2833_v13 = vadd.f32 1e-12, %v2831_v12 }
0x1494   :  { %3837 = vrsqrt.f32 %v2833_v13 }
0x149a   :  { %v3836_v34 = vpop.eup %3835 }
0x149b   :  { %v2836_v29 = vmul.f32 %v3836_v34, %v2820_v10 }
0x149d   :  { %v2842_v15 = vmul.f32 %v2841_v59, %v2836_v29  ;;  %v3061_v29 = vrot.slane %v4565_v35, %v1680_v55 }
0x149e   :  { %v3838_v14 = vpop.eup %3837 }
0x149f   :  { %v2837_v21 = vmul.f32 %v3838_v14, %v2821_v61  ;;  %v2848_v16 = vadd.f32 %v2847_v36, %v2842_v15 }
0x14a1   :  { %v2843_v22 = vmul.f32 %v2841_v59, %v2837_v21  ;;  %v3067_v21 = vrot.slane %v4565_v35, %v1686_v57 }
0x14a3   :  { %v2849_v53 = vadd.f32 %v2847_v36, %v2843_v22 }
0x14a5   :  { %v3215_v4 = vpack.c.bf16 %v2849_v53, %v2848_v16 }
0x14a7   :  { %3611 = vmatmul.mubr.msk.bf16.vlgmr.msra.gmra.mrb[76].mxu0 %vm259_vm6, %v3215_v4 }
0x157a   :  { %v2912_v2 = vpop.f32.mrb[76].mxu0 }
0x157b   :  { %v2913_v3 = vadd.f32 %v3195_v33, %v2912_v2  ;;  %v3612_v27 = vpop.f32.mrb[77].mxu0 }
0x157c   :  { %v2915_v38 = vpop.f32.mrb[78].mxu0 }
0x157d   :  { %v2921_v30 = vmul.f32 0.70710677, %v2913_v3  ;;  %v2916_v31 = vadd.f32 %v3195_v33, %v2915_v38  ;;  %v3613_v40 = vpop.f32.mrb[79].mxu0  ;;  %v2919_v42 = vmul.f32 0.5, %v2913_v3 }
0x157f   :  { %3839 = verf.f32 %v2921_v30  ;;  %v2922_v28 = vmul.f32 0.70710677, %v2916_v31  ;;  %v2920_v43 = vmul.f32 0.5, %v2916_v31 }
0x1581   :  { %3841 = verf.f32 %v2922_v28 }
0x1589   :  { %v3840_v17 = vpop.eup %3839 }
0x158a   :  { %v2925_v39 = vadd.f32 1.0, %v3840_v17 }
0x158b   :  { %v3842_v41 = vpop.eup %3841 }
0x158c   :  { %v2926_v46 = vadd.f32 1.0, %v3842_v41  ;;  %v2927_v47 = vmul.f32 %v2925_v39, %v2919_v42 }
0x158e   :  { %v2928_v48 = vmul.f32 %v2926_v46, %v2920_v43 }
0x1590   :  { %v3216_v50 = vpack.c.bf16 %v2928_v48, %v2927_v47 }
0x1592   :  { %3631 = vmatmul.mubr.bf16.vlgmr.msra.gmra.mrb[84].mxu1 %v3216_v50 }
0x1665   :  { %v3023_v52 = vpop.f32.mrb[84].mxu1 }
0x1666   :  { %v3024_v54 = vadd.f32 %v3023_v52, %v2934_v51  ;;  %v3632_v56 = vpop.f32.mrb[85].mxu1 }
0x1667   :  { %v3026_v26 = vpop.f32.mrb[86].mxu1 }
0x1668   :  { %v3027_v58 = vadd.f32 %v3026_v26, %v2934_v51  ;;  %v3633_v37 = vpop.f32.mrb[87].mxu1  ;;  %v3030_v10 = vadd.f32 %v3024_v54, %v2848_v16 }
0x166a   :  { %v3031_v44 = vadd.f32 %v3027_v58, %v2849_v53  ;;  %v3032_v61 = vsel %vm259_vm6, %v3030_v10, 0.0 }
0x166b   :  { %3033 = vadd.xlane.f32.xlu1 %v3032_v61 }
0x166c   :  { %v3035_v62 = vsel %vm259_vm6, %v3031_v44, 0.0 }
0x166d   :  { %3036 = vadd.xlane.f32.xlu0 %v3035_v62 }
0x16f8   :  { %v3034_v63 = vpop.xlane.xlu1 %3033 }
0x16f9   :  { %v3038_v60 = vmul.f32 0.03125, %v3034_v63 }
0x16fa   :  { %v3037_v0 = vpop.xlane.xlu0 %3036 }
0x16fb   :  { %v3040_v1 = vsub.f32 %v3030_v10, %v3038_v60  ;;  %v3039_v5 = vmul.f32 0.03125, %v3037_v0 }
0x16fd   :  { %v3041_v20 = vsub.f32 %v3031_v44, %v3039_v5  ;;  %v3042_v23 = vmul.f32 %v3040_v1, %v3040_v1 }
0x16ff   :  { %v3044_v24 = vsel %vm259_vm6, %v3042_v23, 0.0  ;;  %v3043_v6 = vmul.f32 %v3041_v20, %v3041_v20 }
0x1700   :  { %3045 = vadd.xlane.f32.xlu1 %v3044_v24 }
0x1701   :  { %v3047_v11 = vsel %vm259_vm6, %v3043_v6, 0.0 }
0x1702   :  { %3048 = vadd.xlane.f32.xlu0 %v3047_v11 }
0x178d   :  { %v3046_v7 = vpop.xlane.xlu1 %3045 }
0x178e   :  { %v3050_v8 = vmul.f32 0.03125, %v3046_v7 }
0x178f   :  { %v3049_v12 = vpop.xlane.xlu0 %3048 }
0x1790   :  { %v3052_v13 = vadd.f32 1e-12, %v3050_v8  ;;  %v3051_v34 = vmul.f32 0.03125, %v3049_v12 }
0x1792   :  { %3843 = vrsqrt.f32 %v3052_v13  ;;  %v3053_v59 = vadd.f32 1e-12, %v3051_v34 }
0x1794   :  { %3845 = vrsqrt.f32 %v3053_v59 }
0x179c   :  { %v3844_v14 = vpop.eup %3843 }
0x179d   :  { %v3056_v15 = vmul.f32 %v3844_v14, %v3040_v1 }
0x179e   :  { %v3846_v36 = vpop.eup %3845 }
0x179f   :  { %v3057_v22 = vmul.f32 %v3846_v36, %v3041_v20  ;;  %v3062_v16 = vmul.f32 %v3061_v29, %v3056_v15 }
0x17a1   :  { %v3063_v53 = vmul.f32 %v3061_v29, %v3057_v22  ;;  %v3068_v4 = vadd.f32 %v3067_v21, %v3062_v16 }
0x17a3   :  { %v3069_v18 = vadd.f32 %v3067_v21, %v3063_v53  ;;  %3070 = vst.msk [vmem:[#allocation2] sm:$0xff] %vm259_vm6, %v3068_v4 }
0x17a5   :  { %3071 = vst.msk [vmem:[#allocation2 + $0x8] sm:$0xff] %vm259_vm6, %v3069_v18 }
0x17a6   :  { %3860 = shalt.err (!%p3857_p4)
}
0x17a7   :  { %s3861_s9 = scalar_lea.hbm %s4666_s14, 256 }
0x17a8   :  { %p3862_p5 = scmp.ne.s32.totalorder %s4666_s14, %s3861_s9  ;;  %p3865_p6 = scmp.lt.u32.totalorder %s3861_s9, %s4666_s14 }
0x17aa   :  { %p3867_p7 = pnand %p3865_p6, %p3862_p5 }
0x17ac   :  { %3870 = shalt.err (!%p3867_p7)
}
0x17ad   :  { %s3885_s26 = smov 128  }
0x17ae   :  { %3083 = dma.vmem_to_hbm [thread:$0]  %s3078_s12, 256, %s4666_s14, [#allocation3], %s3885_s26, %s3885_s26, %s3881_s20  }
0x17af   :  { %3871 = dma.done.wait [#allocation3], 256  }
0x17b0   :  { %3872 = vsyncadd [#allocation3], 4294967040 }
0x17b1   :  { %3087 = vsyncpa [#allocation3], 1 }

</bundles_post_ra>
